<compile_context>
chip_gen: v7x
topology: tpu7x:2x2x1
jax: 0.10.0
libtpu: 0.0.40
codegen_flags: <defaults>
</compile_context>

<pallas_src>
import functools

import jax
import jax.numpy as jnp
from jax import lax
from jax.experimental import pallas as pl
from jax.experimental.pallas import tpu as pltpu


def _basic_block_kernel(x_ref, w1_ref, w2_ref, b1_ref, b2_ref, mask_ref,
                        out_ref, xbuf_ref, ybuf_ref, *, width, base):
    """Fused conv3x3+bn+relu -> conv3x3+bn+relu -> +identity -> relu.

    x_ref   : (Nb, C, Lv)  bf16  flattened NCHW input block, Lv = H*W
    w1_ref  : (9, C, C)    bf16  conv1 taps (tap, cout, cin), bn1 scale folded
    w2_ref  : (9, C, C)    bf16  conv2 taps (tap, cout, cin), bn2 scale folded
    b1_ref  : (C, 1)       f32   folded bn1 bias
    b2_ref  : (C, 1)       f32   folded bn2 bias
    mask_ref: (2, Lv)      f32   row-edge masks: [0] kills x==0, [1] kills x==W-1
    out_ref : (Nb, C, Lv)  f32
    xbuf_ref: (C, Lbuf)    bf16  conv1 input with zero halo outside [base, base+Lv)
    ybuf_ref: (C, Lbuf)    bf16  conv2 input, same halo layout
    """
    nb, _, lv = out_ref.shape

    # The halo regions of the persistent scratch are only ever read (the
    # per-image interior store below never touches them) -> zero them once.
    @pl.when(pl.program_id(0) == 0)
    def _init():
        xbuf_ref[...] = jnp.zeros_like(xbuf_ref)
        ybuf_ref[...] = jnp.zeros_like(ybuf_ref)

    mask_l = mask_ref[0:1, :]   # 0 where x == 0      (bogus dx = -1 reads)
    mask_r = mask_ref[1:2, :]   # 0 where x == W - 1  (bogus dx = +1 reads)

    def conv3x3_bn_relu(buf_ref, w_ref, b_ref):
        # 9 accumulating MXU dots on shifted lane windows (K = C each).  The
        # three horizontal-shift groups are accumulated separately so the
        # row-edge correction is just two f32 multiplies at the end.
        accs = [None, None, None]
        for dy in range(3):
            for dx in range(3):
                off = base + (dy - 1) * width + (dx - 1)
                win = buf_ref[:, off:off + lv]                     # (C, Lv) bf16
                d = jnp.dot(w_ref[dy * 3 + dx], win,
                            preferred_element_type=jnp.float32)    # (C, Lv) f32
                accs[dx] = d if accs[dx] is None else accs[dx] + d
        acc = accs[0] * mask_l + accs[1] + accs[2] * mask_r
        return jnp.maximum(acc + b_ref[...], 0.0)                  # f32

    for b in range(nb):
        xbuf_ref[:, base:base + lv] = x_ref[b]                     # lane-aligned
        y1 = conv3x3_bn_relu(xbuf_ref, w1_ref, b1_ref)
        ybuf_ref[:, base:base + lv] = y1.astype(ybuf_ref.dtype)
        y2 = conv3x3_bn_relu(ybuf_ref, w2_ref, b2_ref)
        identity = x_ref[b].astype(jnp.float32)                    # residual in f32
        out_ref[b] = jnp.maximum(y2 + identity, 0.0).astype(out_ref.dtype)


@functools.partial(jax.jit, static_argnames=("images_per_step",))
def basic_block_nchw(x_nchw, w1, w2, s1, b1, s2, b2, *, images_per_step=None):
    """x: (N,C,H,W) f32; w1/w2: (3,3,C,C) HWIO; s*/b*: (C,) folded BN scale/bias."""
    N, C, H, W = x_nchw.shape
    Lv = H * W

    # Halo geometry: the image lives at lanes [base, base+Lv) of a flat VMEM
    # buffer; a 3x3 tap reads the lane window at offset base + dy*W + dx with
    # dy,dx in {-1,0,1}.  base is a multiple of 128 (aligned interior store)
    # and >= W+1 so the top halo covers the most-negative tap offset.
    base = ((W + 1 + 127) // 128) * 128
    lbuf = ((base + Lv + W + 1 + 127) // 128) * 128

    nb = N if images_per_step is None else images_per_step
    assert N % nb == 0, "images_per_step must divide the batch"

    # Single bf16 cast of the input; (H,W)->H*W reshape is a free merge.
    x_flat = x_nchw.reshape(N, C, Lv).astype(jnp.bfloat16)

    # Fold BN scales into conv weights; (tap, cout, cin) layout, bf16 operands.
    w1m = jnp.transpose((w1 * s1).reshape(9, C, C), (0, 2, 1)).astype(jnp.bfloat16)
    w2m = jnp.transpose((w2 * s2).reshape(9, C, C), (0, 2, 1)).astype(jnp.bfloat16)
    b1c = b1.reshape(C, 1).astype(jnp.float32)
    b2c = b2.reshape(C, 1).astype(jnp.float32)

    # Row-edge masks (f32, applied to f32 accumulators): since rows are packed
    # with no horizontal padding, the dx=-1/+1 windows wrap across the row
    # boundary at x==0 / x==W-1; the true contribution there is the zero pad.
    col = jnp.arange(Lv, dtype=jnp.int32) % W
    masks = jnp.stack([(col != 0), (col != W - 1)]).astype(jnp.float32)

    grid_spec = pltpu.PrefetchScalarGridSpec(
        num_scalar_prefetch=0,
        grid=(N // nb,),
        in_specs=[
            pl.BlockSpec((nb, C, Lv), lambda i: (i, 0, 0)),
            pl.BlockSpec((9, C, C), lambda i: (0, 0, 0)),
            pl.BlockSpec((9, C, C), lambda i: (0, 0, 0)),
            pl.BlockSpec((C, 1), lambda i: (0, 0)),
            pl.BlockSpec((C, 1), lambda i: (0, 0)),
            pl.BlockSpec((2, Lv), lambda i: (0, 0)),
        ],
        out_specs=pl.BlockSpec((nb, C, Lv), lambda i: (i, 0, 0)),
        scratch_shapes=[
            pltpu.VMEM((C, lbuf), jnp.bfloat16),   # conv1 input with zero halo
            pltpu.VMEM((C, lbuf), jnp.bfloat16),   # conv2 input with zero halo
        ],
    )

    out_flat = pl.pallas_call(
        functools.partial(_basic_block_kernel, width=W, base=base),
        out_shape=jax.ShapeDtypeStruct((N, C, Lv), jnp.float32),
        grid_spec=grid_spec,
        compiler_params=pltpu.CompilerParams(
            dimension_semantics=("parallel",)),
    )(x_flat, w1m, w2m, b1c, b2c, masks)

    return out_flat.reshape(N, C, H, W)


def _reference_nchw(x, w1, w2, s1, b1, s2, b2):
    dn = ("NCHW", "HWIO", "NCHW")

    def bn(y, s, b):
        return y * s[None, :, None, None] + b[None, :, None, None]

    y = lax.conv_general_dilated(x, w1, (1, 1), "SAME", dimension_numbers=dn)
    y = jnp.maximum(bn(y, s1, b1), 0.0)
    y = lax.conv_general_dilated(y, w2, (1, 1), "SAME", dimension_numbers=dn)
    y = jnp.maximum(bn(y, s2, b2), 0.0)
    return jnp.maximum(y + x, 0.0)


if __name__ == "__main__":
    N, C, H, W = 2, 4, 16, 16     # in_channel == out_channel, stride=1
    key = jax.random.PRNGKey(0)
    kx, kw1, kw2, kg1, kb1, km1, kv1, kg2, kb2, km2, kv2 = jax.random.split(key, 11)

    x_nchw = jax.random.normal(kx, (N, C, H, W), jnp.float32)

    # conv weights (HWIO), no bias — deterministic synthetic init
    w1 = jax.random.normal(kw1, (3, 3, C, C), jnp.float32) * 0.1
    w2 = jax.random.normal(kw2, (3, 3, C, C), jnp.float32) * 0.1

    # BatchNorm2d params (inference form), eps = 1e-5
    eps = 1e-5
    gamma1 = 1.0 + 0.1 * jax.random.normal(kg1, (C,), jnp.float32)
    beta1 = 0.1 * jax.random.normal(kb1, (C,), jnp.float32)
    mean1 = 0.1 * jax.random.normal(km1, (C,), jnp.float32)
    var1 = jnp.abs(jax.random.normal(kv1, (C,), jnp.float32)) + 0.5
    gamma2 = 1.0 + 0.1 * jax.random.normal(kg2, (C,), jnp.float32)
    beta2 = 0.1 * jax.random.normal(kb2, (C,), jnp.float32)
    mean2 = 0.1 * jax.random.normal(km2, (C,), jnp.float32)
    var2 = jnp.abs(jax.random.normal(kv2, (C,), jnp.float32)) + 0.5

    s1 = gamma1 / jnp.sqrt(var1 + eps)
    b1 = beta1 - mean1 * s1
    s2 = gamma2 / jnp.sqrt(var2 + eps)
    b2 = beta2 - mean2 * s2

    out = basic_block_nchw(x_nchw, w1, w2, s1, b1, s2, b2)
    out = jax.block_until_ready(out)

    # correctness check against a pure-JAX f32 reference; bf16 matmul operands
    # (with f32 accumulation) and bf16 input/identity need a loose tolerance.
    ref = _reference_nchw(x_nchw, w1, w2, s1, b1, s2, b2)
    assert out.shape == (N, C, H, W)
    assert jnp.allclose(out, ref, atol=5e-2, rtol=5e-2), "mismatch vs reference"

    print("KERNEL_OK")
</pallas_src>

<mosaic_0001>
module attributes {stable_mosaic.version = 11 : i64} {
  func.func @_basic_block_kernel(%arg0: i32, %arg1: memref<2x4x256xbf16, #tpu.memory_space<vmem>>, %arg2: memref<9x4x4xbf16, #tpu.memory_space<vmem>>, %arg3: memref<9x4x4xbf16, #tpu.memory_space<vmem>>, %arg4: memref<4x1xf32, #tpu.memory_space<vmem>>, %arg5: memref<4x1xf32, #tpu.memory_space<vmem>>, %arg6: memref<2x256xf32, #tpu.memory_space<vmem>>, %arg7: memref<2x4x256xf32, #tpu.memory_space<vmem>>, %arg8: memref<4x512xbf16, #tpu.memory_space<vmem>>, %arg9: memref<4x512xbf16, #tpu.memory_space<vmem>>) attributes {dimension_semantics = [#tpu.dimension_semantics<parallel>], iteration_bounds = array<i64: 1>, scalar_prefetch = 0 : i64, scratch_operands = 2 : i64, tpu.core_type = #tpu.core_type<tc>, window_params = [{transform_indices = @transform_0, window_bounds = array<i64: 2, 4, 256>}, {pipeline_mode = #tpu.pipeline_mode<synchronous>, transform_indices = @transform_1, window_bounds = array<i64: 9, 4, 4>}, {pipeline_mode = #tpu.pipeline_mode<synchronous>, transform_indices = @transform_2, window_bounds = array<i64: 9, 4, 4>}, {pipeline_mode = #tpu.pipeline_mode<synchronous>, transform_indices = @transform_3, window_bounds = array<i64: 4, 1>}, {pipeline_mode = #tpu.pipeline_mode<synchronous>, transform_indices = @transform_4, window_bounds = array<i64: 4, 1>}, {pipeline_mode = #tpu.pipeline_mode<synchronous>, transform_indices = @transform_5, window_bounds = array<i64: 2, 256>}, {transform_indices = @transform_6, window_bounds = array<i64: 2, 4, 256>}]} {
    %c0_i32 = arith.constant 0 : i32
    %0 = arith.cmpi eq, %arg0, %c0_i32 : i32
    %1 = arith.extui %0 : i1 to i32
    %c0_i32_0 = arith.constant 0 : i32
    %2 = arith.cmpi ne, %1, %c0_i32_0 : i32
    scf.if %2 {
      %cst_242 = arith.constant 0.000000e+00 : bf16
      %245 = vector.broadcast %cst_242 : bf16 to vector<4x512xbf16>
      %c0_243 = arith.constant 0 : index
      %c0_244 = arith.constant 0 : index
      %246 = vector.load %arg8[%c0_243, %c0_244] : memref<4x512xbf16, #tpu.memory_space<vmem>>, vector<4x512xbf16>
      tpu.vector_store %arg8[%c0_243, %c0_244], %245 {strides = array<i32>} : memref<4x512xbf16, #tpu.memory_space<vmem>>, vector<4x512xbf16>,
      %cst_245 = arith.constant 0.000000e+00 : bf16
      %247 = vector.broadcast %cst_245 : bf16 to vector<4x512xbf16>
      %c0_246 = arith.constant 0 : index
      %c0_247 = arith.constant 0 : index
      %248 = vector.load %arg9[%c0_246, %c0_247] : memref<4x512xbf16, #tpu.memory_space<vmem>>, vector<4x512xbf16>
      tpu.vector_store %arg9[%c0_246, %c0_247], %247 {strides = array<i32>} : memref<4x512xbf16, #tpu.memory_space<vmem>>, vector<4x512xbf16>,
    } else {
    }
    %c0 = arith.constant 0 : index
    %c0_1 = arith.constant 0 : index
    %3 = vector.load %arg6[%c0, %c0_1] : memref<2x256xf32, #tpu.memory_space<vmem>>, vector<1x256xf32>
    %c1 = arith.constant 1 : index
    %c0_2 = arith.constant 0 : index
    %4 = vector.load %arg6[%c1, %c0_2] : memref<2x256xf32, #tpu.memory_space<vmem>>, vector<1x256xf32>
    %c0_3 = arith.constant 0 : index
    %c0_4 = arith.constant 0 : index
    %c0_5 = arith.constant 0 : index
    %5 = vector.load %arg1[%c0_3, %c0_4, %c0_5] : memref<2x4x256xbf16, #tpu.memory_space<vmem>>, vector<1x4x256xbf16>
    %6 = vector.shape_cast %5 : vector<1x4x256xbf16> to vector<4x256xbf16>
    %c0_6 = arith.constant 0 : index
    %c128 = arith.constant 128 : index
    %7 = vector.load %arg8[%c0_6, %c128] : memref<4x512xbf16, #tpu.memory_space<vmem>>, vector<4x256xbf16>
    tpu.vector_store %arg8[%c0_6, %c128], %6 {strides = array<i32>} : memref<4x512xbf16, #tpu.memory_space<vmem>>, vector<4x256xbf16>,
    %c0_7 = arith.constant 0 : index
    %c111 = arith.constant 111 : index
    %8 = vector.load %arg8[%c0_7, %c111] : memref<4x512xbf16, #tpu.memory_space<vmem>>, vector<4x256xbf16>
    %c0_8 = arith.constant 0 : index
    %c0_9 = arith.constant 0 : index
    %c0_10 = arith.constant 0 : index
    %9 = vector.load %arg2[%c0_8, %c0_9, %c0_10] : memref<9x4x4xbf16, #tpu.memory_space<vmem>>, vector<1x4x4xbf16>
    %10 = vector.shape_cast %9 : vector<1x4x4xbf16> to vector<4x4xbf16>
    %cst = arith.constant dense<0.000000e+00> : vector<4x256xf32>
    %11 = tpu.matmul %10, %8, %cst {dimension_numbers = #tpu.dot_dimension_numbers<[1], [0], [0], [1], [0, 0, 1, 1], [], []>} : vector<4x4xbf16>, vector<4x256xbf16>, vector<4x256xf32> -> vector<4x256xf32>
    %c0_11 = arith.constant 0 : index
    %c112 = arith.constant 112 : index
    %12 = vector.load %arg8[%c0_11, %c112] : memref<4x512xbf16, #tpu.memory_space<vmem>>, vector<4x256xbf16>
    %c1_12 = arith.constant 1 : index
    %c0_13 = arith.constant 0 : index
    %c0_14 = arith.constant 0 : index
    %13 = vector.load %arg2[%c1_12, %c0_13, %c0_14] : memref<9x4x4xbf16, #tpu.memory_space<vmem>>, vector<1x4x4xbf16>
    %14 = vector.shape_cast %13 : vector<1x4x4xbf16> to vector<4x4xbf16>
    %cst_15 = arith.constant dense<0.000000e+00> : vector<4x256xf32>
    %15 = tpu.matmul %14, %12, %cst_15 {dimension_numbers = #tpu.dot_dimension_numbers<[1], [0], [0], [1], [0, 0, 1, 1], [], []>} : vector<4x4xbf16>, vector<4x256xbf16>, vector<4x256xf32> -> vector<4x256xf32>
    %c0_16 = arith.constant 0 : index
    %c113 = arith.constant 113 : index
    %16 = vector.load %arg8[%c0_16, %c113] : memref<4x512xbf16, #tpu.memory_space<vmem>>, vector<4x256xbf16>
    %c2 = arith.constant 2 : index
    %c0_17 = arith.constant 0 : index
    %c0_18 = arith.constant 0 : index
    %17 = vector.load %arg2[%c2, %c0_17, %c0_18] : memref<9x4x4xbf16, #tpu.memory_space<vmem>>, vector<1x4x4xbf16>
    %18 = vector.shape_cast %17 : vector<1x4x4xbf16> to vector<4x4xbf16>
    %cst_19 = arith.constant dense<0.000000e+00> : vector<4x256xf32>
    %19 = tpu.matmul %18, %16, %cst_19 {dimension_numbers = #tpu.dot_dimension_numbers<[1], [0], [0], [1], [0, 0, 1, 1], [], []>} : vector<4x4xbf16>, vector<4x256xbf16>, vector<4x256xf32> -> vector<4x256xf32>
    %c0_20 = arith.constant 0 : index
    %c127 = arith.constant 127 : index
    %20 = vector.load %arg8[%c0_20, %c127] : memref<4x512xbf16, #tpu.memory_space<vmem>>, vector<4x256xbf16>
    %c3 = arith.constant 3 : index
    %c0_21 = arith.constant 0 : index
    %c0_22 = arith.constant 0 : index
    %21 = vector.load %arg2[%c3, %c0_21, %c0_22] : memref<9x4x4xbf16, #tpu.memory_space<vmem>>, vector<1x4x4xbf16>
    %22 = vector.shape_cast %21 : vector<1x4x4xbf16> to vector<4x4xbf16>
    %cst_23 = arith.constant dense<0.000000e+00> : vector<4x256xf32>
    %23 = tpu.matmul %22, %20, %cst_23 {dimension_numbers = #tpu.dot_dimension_numbers<[1], [0], [0], [1], [0, 0, 1, 1], [], []>} : vector<4x4xbf16>, vector<4x256xbf16>, vector<4x256xf32> -> vector<4x256xf32>
    %24 = arith.addf %11, %23 : vector<4x256xf32>
    %c0_24 = arith.constant 0 : index
    %c128_25 = arith.constant 128 : index
    %25 = vector.load %arg8[%c0_24, %c128_25] : memref<4x512xbf16, #tpu.memory_space<vmem>>, vector<4x256xbf16>
    %c4 = arith.constant 4 : index
    %c0_26 = arith.constant 0 : index
    %c0_27 = arith.constant 0 : index
    %26 = vector.load %arg2[%c4, %c0_26, %c0_27] : memref<9x4x4xbf16, #tpu.memory_space<vmem>>, vector<1x4x4xbf16>
    %27 = vector.shape_cast %26 : vector<1x4x4xbf16> to vector<4x4xbf16>
    %cst_28 = arith.constant dense<0.000000e+00> : vector<4x256xf32>
    %28 = tpu.matmul %27, %25, %cst_28 {dimension_numbers = #tpu.dot_dimension_numbers<[1], [0], [0], [1], [0, 0, 1, 1], [], []>} : vector<4x4xbf16>, vector<4x256xbf16>, vector<4x256xf32> -> vector<4x256xf32>
    %29 = arith.addf %15, %28 : vector<4x256xf32>
    %c0_29 = arith.constant 0 : index
    %c129 = arith.constant 129 : index
    %30 = vector.load %arg8[%c0_29, %c129] : memref<4x512xbf16, #tpu.memory_space<vmem>>, vector<4x256xbf16>
    %c5 = arith.constant 5 : index
    %c0_30 = arith.constant 0 : index
    %c0_31 = arith.constant 0 : index
    %31 = vector.load %arg2[%c5, %c0_30, %c0_31] : memref<9x4x4xbf16, #tpu.memory_space<vmem>>, vector<1x4x4xbf16>
    %32 = vector.shape_cast %31 : vector<1x4x4xbf16> to vector<4x4xbf16>
    %cst_32 = arith.constant dense<0.000000e+00> : vector<4x256xf32>
    %33 = tpu.matmul %32, %30, %cst_32 {dimension_numbers = #tpu.dot_dimension_numbers<[1], [0], [0], [1], [0, 0, 1, 1], [], []>} : vector<4x4xbf16>, vector<4x256xbf16>, vector<4x256xf32> -> vector<4x256xf32>
    %34 = arith.addf %19, %33 : vector<4x256xf32>
    %c0_33 = arith.constant 0 : index
    %c143 = arith.constant 143 : index
    %35 = vector.load %arg8[%c0_33, %c143] : memref<4x512xbf16, #tpu.memory_space<vmem>>, vector<4x256xbf16>
    %c6 = arith.constant 6 : index
    %c0_34 = arith.constant 0 : index
    %c0_35 = arith.constant 0 : index
    %36 = vector.load %arg2[%c6, %c0_34, %c0_35] : memref<9x4x4xbf16, #tpu.memory_space<vmem>>, vector<1x4x4xbf16>
    %37 = vector.shape_cast %36 : vector<1x4x4xbf16> to vector<4x4xbf16>
    %cst_36 = arith.constant dense<0.000000e+00> : vector<4x256xf32>
    %38 = tpu.matmul %37, %35, %cst_36 {dimension_numbers = #tpu.dot_dimension_numbers<[1], [0], [0], [1], [0, 0, 1, 1], [], []>} : vector<4x4xbf16>, vector<4x256xbf16>, vector<4x256xf32> -> vector<4x256xf32>
    %39 = arith.addf %24, %38 : vector<4x256xf32>
    %c0_37 = arith.constant 0 : index
    %c144 = arith.constant 144 : index
    %40 = vector.load %arg8[%c0_37, %c144] : memref<4x512xbf16, #tpu.memory_space<vmem>>, vector<4x256xbf16>
    %c7 = arith.constant 7 : index
    %c0_38 = arith.constant 0 : index
    %c0_39 = arith.constant 0 : index
    %41 = vector.load %arg2[%c7, %c0_38, %c0_39] : memref<9x4x4xbf16, #tpu.memory_space<vmem>>, vector<1x4x4xbf16>
    %42 = vector.shape_cast %41 : vector<1x4x4xbf16> to vector<4x4xbf16>
    %cst_40 = arith.constant dense<0.000000e+00> : vector<4x256xf32>
    %43 = tpu.matmul %42, %40, %cst_40 {dimension_numbers = #tpu.dot_dimension_numbers<[1], [0], [0], [1], [0, 0, 1, 1], [], []>} : vector<4x4xbf16>, vector<4x256xbf16>, vector<4x256xf32> -> vector<4x256xf32>
    %44 = arith.addf %29, %43 : vector<4x256xf32>
    %c0_41 = arith.constant 0 : index
    %c145 = arith.constant 145 : index
    %45 = vector.load %arg8[%c0_41, %c145] : memref<4x512xbf16, #tpu.memory_space<vmem>>, vector<4x256xbf16>
    %c8 = arith.constant 8 : index
    %c0_42 = arith.constant 0 : index
    %c0_43 = arith.constant 0 : index
    %46 = vector.load %arg2[%c8, %c0_42, %c0_43] : memref<9x4x4xbf16, #tpu.memory_space<vmem>>, vector<1x4x4xbf16>
    %47 = vector.shape_cast %46 : vector<1x4x4xbf16> to vector<4x4xbf16>
    %cst_44 = arith.constant dense<0.000000e+00> : vector<4x256xf32>
    %48 = tpu.matmul %47, %45, %cst_44 {dimension_numbers = #tpu.dot_dimension_numbers<[1], [0], [0], [1], [0, 0, 1, 1], [], []>} : vector<4x4xbf16>, vector<4x256xbf16>, vector<4x256xf32> -> vector<4x256xf32>
    %49 = arith.addf %34, %48 : vector<4x256xf32>
    %50 = vector.broadcast %3 : vector<1x256xf32> to vector<4x256xf32>
    %51 = arith.mulf %39, %50 : vector<4x256xf32>
    %52 = arith.addf %51, %44 : vector<4x256xf32>
    %53 = vector.broadcast %4 : vector<1x256xf32> to vector<4x256xf32>
    %54 = arith.mulf %49, %53 : vector<4x256xf32>
    %55 = arith.addf %52, %54 : vector<4x256xf32>
    %c0_45 = arith.constant 0 : index
    %c0_46 = arith.constant 0 : index
    %56 = vector.load %arg4[%c0_45, %c0_46] : memref<4x1xf32, #tpu.memory_space<vmem>>, vector<4x1xf32>
    %57 = vector.broadcast %56 : vector<4x1xf32> to vector<4x256xf32>
    %58 = arith.addf %55, %57 : vector<4x256xf32>
    %cst_47 = arith.constant 0.000000e+00 : f32
    %59 = vector.broadcast %cst_47 : f32 to vector<4x256xf32>
    %60 = arith.maximumf %58, %59 : vector<4x256xf32>
    %61 = arith.truncf %60 : vector<4x256xf32> to vector<4x256xbf16>
    %c0_48 = arith.constant 0 : index
    %c128_49 = arith.constant 128 : index
    %62 = vector.load %arg9[%c0_48, %c128_49] : memref<4x512xbf16, #tpu.memory_space<vmem>>, vector<4x256xbf16>
    tpu.vector_store %arg9[%c0_48, %c128_49], %61 {strides = array<i32>} : memref<4x512xbf16, #tpu.memory_space<vmem>>, vector<4x256xbf16>,
    %c0_50 = arith.constant 0 : index
    %c111_51 = arith.constant 111 : index
    %63 = vector.load %arg9[%c0_50, %c111_51] : memref<4x512xbf16, #tpu.memory_space<vmem>>, vector<4x256xbf16>
    %c0_52 = arith.constant 0 : index
    %c0_53 = arith.constant 0 : index
    %c0_54 = arith.constant 0 : index
    %64 = vector.load %arg3[%c0_52, %c0_53, %c0_54] : memref<9x4x4xbf16, #tpu.memory_space<vmem>>, vector<1x4x4xbf16>
    %65 = vector.shape_cast %64 : vector<1x4x4xbf16> to vector<4x4xbf16>
    %cst_55 = arith.constant dense<0.000000e+00> : vector<4x256xf32>
    %66 = tpu.matmul %65, %63, %cst_55 {dimension_numbers = #tpu.dot_dimension_numbers<[1], [0], [0], [1], [0, 0, 1, 1], [], []>} : vector<4x4xbf16>, vector<4x256xbf16>, vector<4x256xf32> -> vector<4x256xf32>
    %c0_56 = arith.constant 0 : index
    %c112_57 = arith.constant 112 : index
    %67 = vector.load %arg9[%c0_56, %c112_57] : memref<4x512xbf16, #tpu.memory_space<vmem>>, vector<4x256xbf16>
    %c1_58 = arith.constant 1 : index
    %c0_59 = arith.constant 0 : index
    %c0_60 = arith.constant 0 : index
    %68 = vector.load %arg3[%c1_58, %c0_59, %c0_60] : memref<9x4x4xbf16, #tpu.memory_space<vmem>>, vector<1x4x4xbf16>
    %69 = vector.shape_cast %68 : vector<1x4x4xbf16> to vector<4x4xbf16>
    %cst_61 = arith.constant dense<0.000000e+00> : vector<4x256xf32>
    %70 = tpu.matmul %69, %67, %cst_61 {dimension_numbers = #tpu.dot_dimension_numbers<[1], [0], [0], [1], [0, 0, 1, 1], [], []>} : vector<4x4xbf16>, vector<4x256xbf16>, vector<4x256xf32> -> vector<4x256xf32>
    %c0_62 = arith.constant 0 : index
    %c113_63 = arith.constant 113 : index
    %71 = vector.load %arg9[%c0_62, %c113_63] : memref<4x512xbf16, #tpu.memory_space<vmem>>, vector<4x256xbf16>
    %c2_64 = arith.constant 2 : index
    %c0_65 = arith.constant 0 : index
    %c0_66 = arith.constant 0 : index
    %72 = vector.load %arg3[%c2_64, %c0_65, %c0_66] : memref<9x4x4xbf16, #tpu.memory_space<vmem>>, vector<1x4x4xbf16>
    %73 = vector.shape_cast %72 : vector<1x4x4xbf16> to vector<4x4xbf16>
    %cst_67 = arith.constant dense<0.000000e+00> : vector<4x256xf32>
    %74 = tpu.matmul %73, %71, %cst_67 {dimension_numbers = #tpu.dot_dimension_numbers<[1], [0], [0], [1], [0, 0, 1, 1], [], []>} : vector<4x4xbf16>, vector<4x256xbf16>, vector<4x256xf32> -> vector<4x256xf32>
    %c0_68 = arith.constant 0 : index
    %c127_69 = arith.constant 127 : index
    %75 = vector.load %arg9[%c0_68, %c127_69] : memref<4x512xbf16, #tpu.memory_space<vmem>>, vector<4x256xbf16>
    %c3_70 = arith.constant 3 : index
    %c0_71 = arith.constant 0 : index
    %c0_72 = arith.constant 0 : index
    %76 = vector.load %arg3[%c3_70, %c0_71, %c0_72] : memref<9x4x4xbf16, #tpu.memory_space<vmem>>, vector<1x4x4xbf16>
    %77 = vector.shape_cast %76 : vector<1x4x4xbf16> to vector<4x4xbf16>
    %cst_73 = arith.constant dense<0.000000e+00> : vector<4x256xf32>
    %78 = tpu.matmul %77, %75, %cst_73 {dimension_numbers = #tpu.dot_dimension_numbers<[1], [0], [0], [1], [0, 0, 1, 1], [], []>} : vector<4x4xbf16>, vector<4x256xbf16>, vector<4x256xf32> -> vector<4x256xf32>
    %79 = arith.addf %66, %78 : vector<4x256xf32>
    %c0_74 = arith.constant 0 : index
    %c128_75 = arith.constant 128 : index
    %80 = vector.load %arg9[%c0_74, %c128_75] : memref<4x512xbf16, #tpu.memory_space<vmem>>, vector<4x256xbf16>
    %c4_76 = arith.constant 4 : index
    %c0_77 = arith.constant 0 : index
    %c0_78 = arith.constant 0 : index
    %81 = vector.load %arg3[%c4_76, %c0_77, %c0_78] : memref<9x4x4xbf16, #tpu.memory_space<vmem>>, vector<1x4x4xbf16>
    %82 = vector.shape_cast %81 : vector<1x4x4xbf16> to vector<4x4xbf16>
    %cst_79 = arith.constant dense<0.000000e+00> : vector<4x256xf32>
    %83 = tpu.matmul %82, %80, %cst_79 {dimension_numbers = #tpu.dot_dimension_numbers<[1], [0], [0], [1], [0, 0, 1, 1], [], []>} : vector<4x4xbf16>, vector<4x256xbf16>, vector<4x256xf32> -> vector<4x256xf32>
    %84 = arith.addf %70, %83 : vector<4x256xf32>
    %c0_80 = arith.constant 0 : index
    %c129_81 = arith.constant 129 : index
    %85 = vector.load %arg9[%c0_80, %c129_81] : memref<4x512xbf16, #tpu.memory_space<vmem>>, vector<4x256xbf16>
    %c5_82 = arith.constant 5 : index
    %c0_83 = arith.constant 0 : index
    %c0_84 = arith.constant 0 : index
    %86 = vector.load %arg3[%c5_82, %c0_83, %c0_84] : memref<9x4x4xbf16, #tpu.memory_space<vmem>>, vector<1x4x4xbf16>
    %87 = vector.shape_cast %86 : vector<1x4x4xbf16> to vector<4x4xbf16>
    %cst_85 = arith.constant dense<0.000000e+00> : vector<4x256xf32>
    %88 = tpu.matmul %87, %85, %cst_85 {dimension_numbers = #tpu.dot_dimension_numbers<[1], [0], [0], [1], [0, 0, 1, 1], [], []>} : vector<4x4xbf16>, vector<4x256xbf16>, vector<4x256xf32> -> vector<4x256xf32>
    %89 = arith.addf %74, %88 : vector<4x256xf32>
    %c0_86 = arith.constant 0 : index
    %c143_87 = arith.constant 143 : index
    %90 = vector.load %arg9[%c0_86, %c143_87] : memref<4x512xbf16, #tpu.memory_space<vmem>>, vector<4x256xbf16>
    %c6_88 = arith.constant 6 : index
    %c0_89 = arith.constant 0 : index
    %c0_90 = arith.constant 0 : index
    %91 = vector.load %arg3[%c6_88, %c0_89, %c0_90] : memref<9x4x4xbf16, #tpu.memory_space<vmem>>, vector<1x4x4xbf16>
    %92 = vector.shape_cast %91 : vector<1x4x4xbf16> to vector<4x4xbf16>
    %cst_91 = arith.constant dense<0.000000e+00> : vector<4x256xf32>
    %93 = tpu.matmul %92, %90, %cst_91 {dimension_numbers = #tpu.dot_dimension_numbers<[1], [0], [0], [1], [0, 0, 1, 1], [], []>} : vector<4x4xbf16>, vector<4x256xbf16>, vector<4x256xf32> -> vector<4x256xf32>
    %94 = arith.addf %79, %93 : vector<4x256xf32>
    %c0_92 = arith.constant 0 : index
    %c144_93 = arith.constant 144 : index
    %95 = vector.load %arg9[%c0_92, %c144_93] : memref<4x512xbf16, #tpu.memory_space<vmem>>, vector<4x256xbf16>
    %c7_94 = arith.constant 7 : index
    %c0_95 = arith.constant 0 : index
    %c0_96 = arith.constant 0 : index
    %96 = vector.load %arg3[%c7_94, %c0_95, %c0_96] : memref<9x4x4xbf16, #tpu.memory_space<vmem>>, vector<1x4x4xbf16>
    %97 = vector.shape_cast %96 : vector<1x4x4xbf16> to vector<4x4xbf16>
    %cst_97 = arith.constant dense<0.000000e+00> : vector<4x256xf32>
    %98 = tpu.matmul %97, %95, %cst_97 {dimension_numbers = #tpu.dot_dimension_numbers<[1], [0], [0], [1], [0, 0, 1, 1], [], []>} : vector<4x4xbf16>, vector<4x256xbf16>, vector<4x256xf32> -> vector<4x256xf32>
    %99 = arith.addf %84, %98 : vector<4x256xf32>
    %c0_98 = arith.constant 0 : index
    %c145_99 = arith.constant 145 : index
    %100 = vector.load %arg9[%c0_98, %c145_99] : memref<4x512xbf16, #tpu.memory_space<vmem>>, vector<4x256xbf16>
    %c8_100 = arith.constant 8 : index
    %c0_101 = arith.constant 0 : index
    %c0_102 = arith.constant 0 : index
    %101 = vector.load %arg3[%c8_100, %c0_101, %c0_102] : memref<9x4x4xbf16, #tpu.memory_space<vmem>>, vector<1x4x4xbf16>
    %102 = vector.shape_cast %101 : vector<1x4x4xbf16> to vector<4x4xbf16>
    %cst_103 = arith.constant dense<0.000000e+00> : vector<4x256xf32>
    %103 = tpu.matmul %102, %100, %cst_103 {dimension_numbers = #tpu.dot_dimension_numbers<[1], [0], [0], [1], [0, 0, 1, 1], [], []>} : vector<4x4xbf16>, vector<4x256xbf16>, vector<4x256xf32> -> vector<4x256xf32>
    %104 = arith.addf %89, %103 : vector<4x256xf32>
    %105 = vector.broadcast %3 : vector<1x256xf32> to vector<4x256xf32>
    %106 = arith.mulf %94, %105 : vector<4x256xf32>
    %107 = arith.addf %106, %99 : vector<4x256xf32>
    %108 = vector.broadcast %4 : vector<1x256xf32> to vector<4x256xf32>
    %109 = arith.mulf %104, %108 : vector<4x256xf32>
    %110 = arith.addf %107, %109 : vector<4x256xf32>
    %c0_104 = arith.constant 0 : index
    %c0_105 = arith.constant 0 : index
    %111 = vector.load %arg5[%c0_104, %c0_105] : memref<4x1xf32, #tpu.memory_space<vmem>>, vector<4x1xf32>
    %112 = vector.broadcast %111 : vector<4x1xf32> to vector<4x256xf32>
    %113 = arith.addf %110, %112 : vector<4x256xf32>
    %cst_106 = arith.constant 0.000000e+00 : f32
    %114 = vector.broadcast %cst_106 : f32 to vector<4x256xf32>
    %115 = arith.maximumf %113, %114 : vector<4x256xf32>
    %c0_107 = arith.constant 0 : index
    %c0_108 = arith.constant 0 : index
    %c0_109 = arith.constant 0 : index
    %116 = vector.load %arg1[%c0_107, %c0_108, %c0_109] : memref<2x4x256xbf16, #tpu.memory_space<vmem>>, vector<1x4x256xbf16>
    %117 = vector.shape_cast %116 : vector<1x4x256xbf16> to vector<4x256xbf16>
    %118 = arith.extf %117 : vector<4x256xbf16> to vector<4x256xf32>
    %119 = arith.addf %115, %118 : vector<4x256xf32>
    %cst_110 = arith.constant 0.000000e+00 : f32
    %120 = vector.broadcast %cst_110 : f32 to vector<4x256xf32>
    %121 = arith.maximumf %119, %120 : vector<4x256xf32>
    %c0_111 = arith.constant 0 : index
    %c0_112 = arith.constant 0 : index
    %c0_113 = arith.constant 0 : index
    %122 = vector.load %arg7[%c0_111, %c0_112, %c0_113] : memref<2x4x256xf32, #tpu.memory_space<vmem>>, vector<1x4x256xf32>
    %123 = vector.shape_cast %122 : vector<1x4x256xf32> to vector<4x256xf32>
    %124 = vector.shape_cast %121 : vector<4x256xf32> to vector<1x4x256xf32>
    tpu.vector_store %arg7[%c0_111, %c0_112, %c0_113], %124 {strides = array<i32>} : memref<2x4x256xf32, #tpu.memory_space<vmem>>, vector<1x4x256xf32>,
    %c1_114 = arith.constant 1 : index
    %c0_115 = arith.constant 0 : index
    %c0_116 = arith.constant 0 : index
    %125 = vector.load %arg1[%c1_114, %c0_115, %c0_116] : memref<2x4x256xbf16, #tpu.memory_space<vmem>>, vector<1x4x256xbf16>
    %126 = vector.shape_cast %125 : vector<1x4x256xbf16> to vector<4x256xbf16>
    %c0_117 = arith.constant 0 : index
    %c128_118 = arith.constant 128 : index
    %127 = vector.load %arg8[%c0_117, %c128_118] : memref<4x512xbf16, #tpu.memory_space<vmem>>, vector<4x256xbf16>
    tpu.vector_store %arg8[%c0_117, %c128_118], %126 {strides = array<i32>} : memref<4x512xbf16, #tpu.memory_space<vmem>>, vector<4x256xbf16>,
    %c0_119 = arith.constant 0 : index
    %c111_120 = arith.constant 111 : index
    %128 = vector.load %arg8[%c0_119, %c111_120] : memref<4x512xbf16, #tpu.memory_space<vmem>>, vector<4x256xbf16>
    %c0_121 = arith.constant 0 : index
    %c0_122 = arith.constant 0 : index
    %c0_123 = arith.constant 0 : index
    %129 = vector.load %arg2[%c0_121, %c0_122, %c0_123] : memref<9x4x4xbf16, #tpu.memory_space<vmem>>, vector<1x4x4xbf16>
    %130 = vector.shape_cast %129 : vector<1x4x4xbf16> to vector<4x4xbf16>
    %cst_124 = arith.constant dense<0.000000e+00> : vector<4x256xf32>
    %131 = tpu.matmul %130, %128, %cst_124 {dimension_numbers = #tpu.dot_dimension_numbers<[1], [0], [0], [1], [0, 0, 1, 1], [], []>} : vector<4x4xbf16>, vector<4x256xbf16>, vector<4x256xf32> -> vector<4x256xf32>
    %c0_125 = arith.constant 0 : index
    %c112_126 = arith.constant 112 : index
    %132 = vector.load %arg8[%c0_125, %c112_126] : memref<4x512xbf16, #tpu.memory_space<vmem>>, vector<4x256xbf16>
    %c1_127 = arith.constant 1 : index
    %c0_128 = arith.constant 0 : index
    %c0_129 = arith.constant 0 : index
    %133 = vector.load %arg2[%c1_127, %c0_128, %c0_129] : memref<9x4x4xbf16, #tpu.memory_space<vmem>>, vector<1x4x4xbf16>
    %134 = vector.shape_cast %133 : vector<1x4x4xbf16> to vector<4x4xbf16>
    %cst_130 = arith.constant dense<0.000000e+00> : vector<4x256xf32>
    %135 = tpu.matmul %134, %132, %cst_130 {dimension_numbers = #tpu.dot_dimension_numbers<[1], [0], [0], [1], [0, 0, 1, 1], [], []>} : vector<4x4xbf16>, vector<4x256xbf16>, vector<4x256xf32> -> vector<4x256xf32>
    %c0_131 = arith.constant 0 : index
    %c113_132 = arith.constant 113 : index
    %136 = vector.load %arg8[%c0_131, %c113_132] : memref<4x512xbf16, #tpu.memory_space<vmem>>, vector<4x256xbf16>
    %c2_133 = arith.constant 2 : index
    %c0_134 = arith.constant 0 : index
    %c0_135 = arith.constant 0 : index
    %137 = vector.load %arg2[%c2_133, %c0_134, %c0_135] : memref<9x4x4xbf16, #tpu.memory_space<vmem>>, vector<1x4x4xbf16>
    %138 = vector.shape_cast %137 : vector<1x4x4xbf16> to vector<4x4xbf16>
    %cst_136 = arith.constant dense<0.000000e+00> : vector<4x256xf32>
    %139 = tpu.matmul %138, %136, %cst_136 {dimension_numbers = #tpu.dot_dimension_numbers<[1], [0], [0], [1], [0, 0, 1, 1], [], []>} : vector<4x4xbf16>, vector<4x256xbf16>, vector<4x256xf32> -> vector<4x256xf32>
    %c0_137 = arith.constant 0 : index
    %c127_138 = arith.constant 127 : index
    %140 = vector.load %arg8[%c0_137, %c127_138] : memref<4x512xbf16, #tpu.memory_space<vmem>>, vector<4x256xbf16>
    %c3_139 = arith.constant 3 : index
    %c0_140 = arith.constant 0 : index
    %c0_141 = arith.constant 0 : index
    %141 = vector.load %arg2[%c3_139, %c0_140, %c0_141] : memref<9x4x4xbf16, #tpu.memory_space<vmem>>, vector<1x4x4xbf16>
    %142 = vector.shape_cast %141 : vector<1x4x4xbf16> to vector<4x4xbf16>
    %cst_142 = arith.constant dense<0.000000e+00> : vector<4x256xf32>
    %143 = tpu.matmul %142, %140, %cst_142 {dimension_numbers = #tpu.dot_dimension_numbers<[1], [0], [0], [1], [0, 0, 1, 1], [], []>} : vector<4x4xbf16>, vector<4x256xbf16>, vector<4x256xf32> -> vector<4x256xf32>
    %144 = arith.addf %131, %143 : vector<4x256xf32>
    %c0_143 = arith.constant 0 : index
    %c128_144 = arith.constant 128 : index
    %145 = vector.load %arg8[%c0_143, %c128_144] : memref<4x512xbf16, #tpu.memory_space<vmem>>, vector<4x256xbf16>
    %c4_145 = arith.constant 4 : index
    %c0_146 = arith.constant 0 : index
    %c0_147 = arith.constant 0 : index
    %146 = vector.load %arg2[%c4_145, %c0_146, %c0_147] : memref<9x4x4xbf16, #tpu.memory_space<vmem>>, vector<1x4x4xbf16>
    %147 = vector.shape_cast %146 : vector<1x4x4xbf16> to vector<4x4xbf16>
    %cst_148 = arith.constant dense<0.000000e+00> : vector<4x256xf32>
    %148 = tpu.matmul %147, %145, %cst_148 {dimension_numbers = #tpu.dot_dimension_numbers<[1], [0], [0], [1], [0, 0, 1, 1], [], []>} : vector<4x4xbf16>, vector<4x256xbf16>, vector<4x256xf32> -> vector<4x256xf32>
    %149 = arith.addf %135, %148 : vector<4x256xf32>
    %c0_149 = arith.constant 0 : index
    %c129_150 = arith.constant 129 : index
    %150 = vector.load %arg8[%c0_149, %c129_150] : memref<4x512xbf16, #tpu.memory_space<vmem>>, vector<4x256xbf16>
    %c5_151 = arith.constant 5 : index
    %c0_152 = arith.constant 0 : index
    %c0_153 = arith.constant 0 : index
    %151 = vector.load %arg2[%c5_151, %c0_152, %c0_153] : memref<9x4x4xbf16, #tpu.memory_space<vmem>>, vector<1x4x4xbf16>
    %152 = vector.shape_cast %151 : vector<1x4x4xbf16> to vector<4x4xbf16>
    %cst_154 = arith.constant dense<0.000000e+00> : vector<4x256xf32>
    %153 = tpu.matmul %152, %150, %cst_154 {dimension_numbers = #tpu.dot_dimension_numbers<[1], [0], [0], [1], [0, 0, 1, 1], [], []>} : vector<4x4xbf16>, vector<4x256xbf16>, vector<4x256xf32> -> vector<4x256xf32>
    %154 = arith.addf %139, %153 : vector<4x256xf32>
    %c0_155 = arith.constant 0 : index
    %c143_156 = arith.constant 143 : index
    %155 = vector.load %arg8[%c0_155, %c143_156] : memref<4x512xbf16, #tpu.memory_space<vmem>>, vector<4x256xbf16>
    %c6_157 = arith.constant 6 : index
    %c0_158 = arith.constant 0 : index
    %c0_159 = arith.constant 0 : index
    %156 = vector.load %arg2[%c6_157, %c0_158, %c0_159] : memref<9x4x4xbf16, #tpu.memory_space<vmem>>, vector<1x4x4xbf16>
    %157 = vector.shape_cast %156 : vector<1x4x4xbf16> to vector<4x4xbf16>
    %cst_160 = arith.constant dense<0.000000e+00> : vector<4x256xf32>
    %158 = tpu.matmul %157, %155, %cst_160 {dimension_numbers = #tpu.dot_dimension_numbers<[1], [0], [0], [1], [0, 0, 1, 1], [], []>} : vector<4x4xbf16>, vector<4x256xbf16>, vector<4x256xf32> -> vector<4x256xf32>
    %159 = arith.addf %144, %158 : vector<4x256xf32>
    %c0_161 = arith.constant 0 : index
    %c144_162 = arith.constant 144 : index
    %160 = vector.load %arg8[%c0_161, %c144_162] : memref<4x512xbf16, #tpu.memory_space<vmem>>, vector<4x256xbf16>
    %c7_163 = arith.constant 7 : index
    %c0_164 = arith.constant 0 : index
    %c0_165 = arith.constant 0 : index
    %161 = vector.load %arg2[%c7_163, %c0_164, %c0_165] : memref<9x4x4xbf16, #tpu.memory_space<vmem>>, vector<1x4x4xbf16>
    %162 = vector.shape_cast %161 : vector<1x4x4xbf16> to vector<4x4xbf16>
    %cst_166 = arith.constant dense<0.000000e+00> : vector<4x256xf32>
    %163 = tpu.matmul %162, %160, %cst_166 {dimension_numbers = #tpu.dot_dimension_numbers<[1], [0], [0], [1], [0, 0, 1, 1], [], []>} : vector<4x4xbf16>, vector<4x256xbf16>, vector<4x256xf32> -> vector<4x256xf32>
    %164 = arith.addf %149, %163 : vector<4x256xf32>
    %c0_167 = arith.constant 0 : index
    %c145_168 = arith.constant 145 : index
    %165 = vector.load %arg8[%c0_167, %c145_168] : memref<4x512xbf16, #tpu.memory_space<vmem>>, vector<4x256xbf16>
    %c8_169 = arith.constant 8 : index
    %c0_170 = arith.constant 0 : index
    %c0_171 = arith.constant 0 : index
    %166 = vector.load %arg2[%c8_169, %c0_170, %c0_171] : memref<9x4x4xbf16, #tpu.memory_space<vmem>>, vector<1x4x4xbf16>
    %167 = vector.shape_cast %166 : vector<1x4x4xbf16> to vector<4x4xbf16>
    %cst_172 = arith.constant dense<0.000000e+00> : vector<4x256xf32>
    %168 = tpu.matmul %167, %165, %cst_172 {dimension_numbers = #tpu.dot_dimension_numbers<[1], [0], [0], [1], [0, 0, 1, 1], [], []>} : vector<4x4xbf16>, vector<4x256xbf16>, vector<4x256xf32> -> vector<4x256xf32>
    %169 = arith.addf %154, %168 : vector<4x256xf32>
    %170 = vector.broadcast %3 : vector<1x256xf32> to vector<4x256xf32>
    %171 = arith.mulf %159, %170 : vector<4x256xf32>
    %172 = arith.addf %171, %164 : vector<4x256xf32>
    %173 = vector.broadcast %4 : vector<1x256xf32> to vector<4x256xf32>
    %174 = arith.mulf %169, %173 : vector<4x256xf32>
    %175 = arith.addf %172, %174 : vector<4x256xf32>
    %c0_173 = arith.constant 0 : index
    %c0_174 = arith.constant 0 : index
    %176 = vector.load %arg4[%c0_173, %c0_174] : memref<4x1xf32, #tpu.memory_space<vmem>>, vector<4x1xf32>
    %177 = vector.broadcast %176 : vector<4x1xf32> to vector<4x256xf32>
    %178 = arith.addf %175, %177 : vector<4x256xf32>
    %cst_175 = arith.constant 0.000000e+00 : f32
    %179 = vector.broadcast %cst_175 : f32 to vector<4x256xf32>
    %180 = arith.maximumf %178, %179 : vector<4x256xf32>
    %181 = arith.truncf %180 : vector<4x256xf32> to vector<4x256xbf16>
    %c0_176 = arith.constant 0 : index
    %c128_177 = arith.constant 128 : index
    %182 = vector.load %arg9[%c0_176, %c128_177] : memref<4x512xbf16, #tpu.memory_space<vmem>>, vector<4x256xbf16>
    tpu.vector_store %arg9[%c0_176, %c128_177], %181 {strides = array<i32>} : memref<4x512xbf16, #tpu.memory_space<vmem>>, vector<4x256xbf16>,
    %c0_178 = arith.constant 0 : index
    %c111_179 = arith.constant 111 : index
    %183 = vector.load %arg9[%c0_178, %c111_179] : memref<4x512xbf16, #tpu.memory_space<vmem>>, vector<4x256xbf16>
    %c0_180 = arith.constant 0 : index
    %c0_181 = arith.constant 0 : index
    %c0_182 = arith.constant 0 : index
    %184 = vector.load %arg3[%c0_180, %c0_181, %c0_182] : memref<9x4x4xbf16, #tpu.memory_space<vmem>>, vector<1x4x4xbf16>
    %185 = vector.shape_cast %184 : vector<1x4x4xbf16> to vector<4x4xbf16>
    %cst_183 = arith.constant dense<0.000000e+00> : vector<4x256xf32>
    %186 = tpu.matmul %185, %183, %cst_183 {dimension_numbers = #tpu.dot_dimension_numbers<[1], [0], [0], [1], [0, 0, 1, 1], [], []>} : vector<4x4xbf16>, vector<4x256xbf16>, vector<4x256xf32> -> vector<4x256xf32>
    %c0_184 = arith.constant 0 : index
    %c112_185 = arith.constant 112 : index
    %187 = vector.load %arg9[%c0_184, %c112_185] : memref<4x512xbf16, #tpu.memory_space<vmem>>, vector<4x256xbf16>
    %c1_186 = arith.constant 1 : index
    %c0_187 = arith.constant 0 : index
    %c0_188 = arith.constant 0 : index
    %188 = vector.load %arg3[%c1_186, %c0_187, %c0_188] : memref<9x4x4xbf16, #tpu.memory_space<vmem>>, vector<1x4x4xbf16>
    %189 = vector.shape_cast %188 : vector<1x4x4xbf16> to vector<4x4xbf16>
    %cst_189 = arith.constant dense<0.000000e+00> : vector<4x256xf32>
    %190 = tpu.matmul %189, %187, %cst_189 {dimension_numbers = #tpu.dot_dimension_numbers<[1], [0], [0], [1], [0, 0, 1, 1], [], []>} : vector<4x4xbf16>, vector<4x256xbf16>, vector<4x256xf32> -> vector<4x256xf32>
    %c0_190 = arith.constant 0 : index
    %c113_191 = arith.constant 113 : index
    %191 = vector.load %arg9[%c0_190, %c113_191] : memref<4x512xbf16, #tpu.memory_space<vmem>>, vector<4x256xbf16>
    %c2_192 = arith.constant 2 : index
    %c0_193 = arith.constant 0 : index
    %c0_194 = arith.constant 0 : index
    %192 = vector.load %arg3[%c2_192, %c0_193, %c0_194] : memref<9x4x4xbf16, #tpu.memory_space<vmem>>, vector<1x4x4xbf16>
    %193 = vector.shape_cast %192 : vector<1x4x4xbf16> to vector<4x4xbf16>
    %cst_195 = arith.constant dense<0.000000e+00> : vector<4x256xf32>
    %194 = tpu.matmul %193, %191, %cst_195 {dimension_numbers = #tpu.dot_dimension_numbers<[1], [0], [0], [1], [0, 0, 1, 1], [], []>} : vector<4x4xbf16>, vector<4x256xbf16>, vector<4x256xf32> -> vector<4x256xf32>
    %c0_196 = arith.constant 0 : index
    %c127_197 = arith.constant 127 : index
    %195 = vector.load %arg9[%c0_196, %c127_197] : memref<4x512xbf16, #tpu.memory_space<vmem>>, vector<4x256xbf16>
    %c3_198 = arith.constant 3 : index
    %c0_199 = arith.constant 0 : index
    %c0_200 = arith.constant 0 : index
    %196 = vector.load %arg3[%c3_198, %c0_199, %c0_200] : memref<9x4x4xbf16, #tpu.memory_space<vmem>>, vector<1x4x4xbf16>
    %197 = vector.shape_cast %196 : vector<1x4x4xbf16> to vector<4x4xbf16>
    %cst_201 = arith.constant dense<0.000000e+00> : vector<4x256xf32>
    %198 = tpu.matmul %197, %195, %cst_201 {dimension_numbers = #tpu.dot_dimension_numbers<[1], [0], [0], [1], [0, 0, 1, 1], [], []>} : vector<4x4xbf16>, vector<4x256xbf16>, vector<4x256xf32> -> vector<4x256xf32>
    %199 = arith.addf %186, %198 : vector<4x256xf32>
    %c0_202 = arith.constant 0 : index
    %c128_203 = arith.constant 128 : index
    %200 = vector.load %arg9[%c0_202, %c128_203] : memref<4x512xbf16, #tpu.memory_space<vmem>>, vector<4x256xbf16>
    %c4_204 = arith.constant 4 : index
    %c0_205 = arith.constant 0 : index
    %c0_206 = arith.constant 0 : index
    %201 = vector.load %arg3[%c4_204, %c0_205, %c0_206] : memref<9x4x4xbf16, #tpu.memory_space<vmem>>, vector<1x4x4xbf16>
    %202 = vector.shape_cast %201 : vector<1x4x4xbf16> to vector<4x4xbf16>
    %cst_207 = arith.constant dense<0.000000e+00> : vector<4x256xf32>
    %203 = tpu.matmul %202, %200, %cst_207 {dimension_numbers = #tpu.dot_dimension_numbers<[1], [0], [0], [1], [0, 0, 1, 1], [], []>} : vector<4x4xbf16>, vector<4x256xbf16>, vector<4x256xf32> -> vector<4x256xf32>
    %204 = arith.addf %190, %203 : vector<4x256xf32>
    %c0_208 = arith.constant 0 : index
    %c129_209 = arith.constant 129 : index
    %205 = vector.load %arg9[%c0_208, %c129_209] : memref<4x512xbf16, #tpu.memory_space<vmem>>, vector<4x256xbf16>
    %c5_210 = arith.constant 5 : index
    %c0_211 = arith.constant 0 : index
    %c0_212 = arith.constant 0 : index
    %206 = vector.load %arg3[%c5_210, %c0_211, %c0_212] : memref<9x4x4xbf16, #tpu.memory_space<vmem>>, vector<1x4x4xbf16>
    %207 = vector.shape_cast %206 : vector<1x4x4xbf16> to vector<4x4xbf16>
    %cst_213 = arith.constant dense<0.000000e+00> : vector<4x256xf32>
    %208 = tpu.matmul %207, %205, %cst_213 {dimension_numbers = #tpu.dot_dimension_numbers<[1], [0], [0], [1], [0, 0, 1, 1], [], []>} : vector<4x4xbf16>, vector<4x256xbf16>, vector<4x256xf32> -> vector<4x256xf32>
    %209 = arith.addf %194, %208 : vector<4x256xf32>
    %c0_214 = arith.constant 0 : index
    %c143_215 = arith.constant 143 : index
    %210 = vector.load %arg9[%c0_214, %c143_215] : memref<4x512xbf16, #tpu.memory_space<vmem>>, vector<4x256xbf16>
    %c6_216 = arith.constant 6 : index
    %c0_217 = arith.constant 0 : index
    %c0_218 = arith.constant 0 : index
    %211 = vector.load %arg3[%c6_216, %c0_217, %c0_218] : memref<9x4x4xbf16, #tpu.memory_space<vmem>>, vector<1x4x4xbf16>
    %212 = vector.shape_cast %211 : vector<1x4x4xbf16> to vector<4x4xbf16>
    %cst_219 = arith.constant dense<0.000000e+00> : vector<4x256xf32>
    %213 = tpu.matmul %212, %210, %cst_219 {dimension_numbers = #tpu.dot_dimension_numbers<[1], [0], [0], [1], [0, 0, 1, 1], [], []>} : vector<4x4xbf16>, vector<4x256xbf16>, vector<4x256xf32> -> vector<4x256xf32>
    %214 = arith.addf %199, %213 : vector<4x256xf32>
    %c0_220 = arith.constant 0 : index
    %c144_221 = arith.constant 144 : index
    %215 = vector.load %arg9[%c0_220, %c144_221] : memref<4x512xbf16, #tpu.memory_space<vmem>>, vector<4x256xbf16>
    %c7_222 = arith.constant 7 : index
    %c0_223 = arith.constant 0 : index
    %c0_224 = arith.constant 0 : index
    %216 = vector.load %arg3[%c7_222, %c0_223, %c0_224] : memref<9x4x4xbf16, #tpu.memory_space<vmem>>, vector<1x4x4xbf16>
    %217 = vector.shape_cast %216 : vector<1x4x4xbf16> to vector<4x4xbf16>
    %cst_225 = arith.constant dense<0.000000e+00> : vector<4x256xf32>
    %218 = tpu.matmul %217, %215, %cst_225 {dimension_numbers = #tpu.dot_dimension_numbers<[1], [0], [0], [1], [0, 0, 1, 1], [], []>} : vector<4x4xbf16>, vector<4x256xbf16>, vector<4x256xf32> -> vector<4x256xf32>
    %219 = arith.addf %204, %218 : vector<4x256xf32>
    %c0_226 = arith.constant 0 : index
    %c145_227 = arith.constant 145 : index
    %220 = vector.load %arg9[%c0_226, %c145_227] : memref<4x512xbf16, #tpu.memory_space<vmem>>, vector<4x256xbf16>
    %c8_228 = arith.constant 8 : index
    %c0_229 = arith.constant 0 : index
    %c0_230 = arith.constant 0 : index
    %221 = vector.load %arg3[%c8_228, %c0_229, %c0_230] : memref<9x4x4xbf16, #tpu.memory_space<vmem>>, vector<1x4x4xbf16>
    %222 = vector.shape_cast %221 : vector<1x4x4xbf16> to vector<4x4xbf16>
    %cst_231 = arith.constant dense<0.000000e+00> : vector<4x256xf32>
    %223 = tpu.matmul %222, %220, %cst_231 {dimension_numbers = #tpu.dot_dimension_numbers<[1], [0], [0], [1], [0, 0, 1, 1], [], []>} : vector<4x4xbf16>, vector<4x256xbf16>, vector<4x256xf32> -> vector<4x256xf32>
    %224 = arith.addf %209, %223 : vector<4x256xf32>
    %225 = vector.broadcast %3 : vector<1x256xf32> to vector<4x256xf32>
    %226 = arith.mulf %214, %225 : vector<4x256xf32>
    %227 = arith.addf %226, %219 : vector<4x256xf32>
    %228 = vector.broadcast %4 : vector<1x256xf32> to vector<4x256xf32>
    %229 = arith.mulf %224, %228 : vector<4x256xf32>
    %230 = arith.addf %227, %229 : vector<4x256xf32>
    %c0_232 = arith.constant 0 : index
    %c0_233 = arith.constant 0 : index
    %231 = vector.load %arg5[%c0_232, %c0_233] : memref<4x1xf32, #tpu.memory_space<vmem>>, vector<4x1xf32>
    %232 = vector.broadcast %231 : vector<4x1xf32> to vector<4x256xf32>
    %233 = arith.addf %230, %232 : vector<4x256xf32>
    %cst_234 = arith.constant 0.000000e+00 : f32
    %234 = vector.broadcast %cst_234 : f32 to vector<4x256xf32>
    %235 = arith.maximumf %233, %234 : vector<4x256xf32>
    %c1_235 = arith.constant 1 : index
    %c0_236 = arith.constant 0 : index
    %c0_237 = arith.constant 0 : index
    %236 = vector.load %arg1[%c1_235, %c0_236, %c0_237] : memref<2x4x256xbf16, #tpu.memory_space<vmem>>, vector<1x4x256xbf16>
    %237 = vector.shape_cast %236 : vector<1x4x256xbf16> to vector<4x256xbf16>
    %238 = arith.extf %237 : vector<4x256xbf16> to vector<4x256xf32>
    %239 = arith.addf %235, %238 : vector<4x256xf32>
    %cst_238 = arith.constant 0.000000e+00 : f32
    %240 = vector.broadcast %cst_238 : f32 to vector<4x256xf32>
    %241 = arith.maximumf %239, %240 : vector<4x256xf32>
    %c1_239 = arith.constant 1 : index
    %c0_240 = arith.constant 0 : index
    %c0_241 = arith.constant 0 : index
    %242 = vector.load %arg7[%c1_239, %c0_240, %c0_241] : memref<2x4x256xf32, #tpu.memory_space<vmem>>, vector<1x4x256xf32>
    %243 = vector.shape_cast %242 : vector<1x4x256xf32> to vector<4x256xf32>
    %244 = vector.shape_cast %241 : vector<4x256xf32> to vector<1x4x256xf32>
    tpu.vector_store %arg7[%c1_239, %c0_240, %c0_241], %244 {strides = array<i32>} : memref<2x4x256xf32, #tpu.memory_space<vmem>>, vector<1x4x256xf32>,
    return
  }
  func.func @transform_0(%arg0: i32) -> (i32, i32, i32) {
    %c0_i32 = arith.constant 0 : i32
    %c0_i32_0 = arith.constant 0 : i32
    %c0_i32_1 = arith.constant 0 : i32
    return %arg0, %c0_i32, %c0_i32_0 : i32, i32, i32
  }
  func.func @transform_1(%arg0: i32) -> (i32, i32, i32) {
    %c0_i32 = arith.constant 0 : i32
    %c0_i32_0 = arith.constant 0 : i32
    %c0_i32_1 = arith.constant 0 : i32
    %c0_i32_2 = arith.constant 0 : i32
    return %c0_i32, %c0_i32_0, %c0_i32_1 : i32, i32, i32
  }
  func.func @transform_2(%arg0: i32) -> (i32, i32, i32) {
    %c0_i32 = arith.constant 0 : i32
    %c0_i32_0 = arith.constant 0 : i32
    %c0_i32_1 = arith.constant 0 : i32
    %c0_i32_2 = arith.constant 0 : i32
    return %c0_i32, %c0_i32_0, %c0_i32_1 : i32, i32, i32
  }
  func.func @transform_3(%arg0: i32) -> (i32, i32) {
    %c0_i32 = arith.constant 0 : i32
    %c0_i32_0 = arith.constant 0 : i32
    %c0_i32_1 = arith.constant 0 : i32
    return %c0_i32, %c0_i32_0 : i32, i32
  }
  func.func @transform_4(%arg0: i32) -> (i32, i32) {
    %c0_i32 = arith.constant 0 : i32
    %c0_i32_0 = arith.constant 0 : i32
    %c0_i32_1 = arith.constant 0 : i32
    return %c0_i32, %c0_i32_0 : i32, i32
  }
  func.func @transform_5(%arg0: i32) -> (i32, i32) {
    %c0_i32 = arith.constant 0 : i32
    %c0_i32_0 = arith.constant 0 : i32
    %c0_i32_1 = arith.constant 0 : i32
    return %c0_i32, %c0_i32_0 : i32, i32
  }
  func.func @transform_6(%arg0: i32) -> (i32, i32, i32) {
    %c0_i32 = arith.constant 0 : i32
    %c0_i32_0 = arith.constant 0 : i32
    %c0_i32_1 = arith.constant 0 : i32
    return %arg0, %c0_i32, %c0_i32_0 : i32, i32, i32
  }
}

</mosaic_0001>

<bundles_post_ra>
// kernel: basic_block_nchw.1
= control target key start
LH: loop header
LB: loop body
LE: loop exit
PB: predicated region body
PF: predicated region fallthrough
CT: control target
= control target key end

     0   :  { %v48_v0 = vlaneseq  ;;  %v2947_v1 = vmov 0   ;;  %v2948_v3 = vmov 1983009808   ;;  %s2949_s23 = smov 1   ;;  %s2950_s24 = smov 17   ;;  %vm66_vm0 = vcmask 7168   ;;  %s3552_s0 = inlined_call_operand.vmem [shape: bf16[2,4,256], index: 0, kind: input, shape index: {}]   ;;  %s3553_s3 = inlined_call_operand.vmem [shape: f32[4,1], index: 3, kind: input, shape index: {}]   ;;  %s3554_s1 = inlined_call_operand.vmem [shape: bf16[9,4,4], index: 1, kind: input, shape index: {}]   ;;  %s3555_s5 = inlined_call_operand.vmem [shape: f32[2,256], index: 5, kind: input, shape index: {}]   ;;  %s3556_s2 = inlined_call_operand.vmem [shape: bf16[9,4,4], index: 2, kind: input, shape index: {}]   ;;  %s3557_s4 = inlined_call_operand.vmem [shape: f32[4,1], index: 4, kind: input, shape index: {}]   ;;  %s3558_s6 = inlined_call_operand.vmem [shape: f32[2,4,256], index: 6, kind: output, shape index: {}]  }
   0x1   :  { %28 = vst [vmem:[#allocation2] sm:$0xff] %v2947_v1  ;;  %v33_v2 = vld [vmem:[%s3552_s0] sm:$0xf]  ;;  %v46_v4 = vunpack.c.l.s4 %v2948_v3  ;;  %29 = vst [vmem:[#allocation3] sm:$0xff] %v2947_v1  ;;  %112 = vmatprep.mubr.bf16.mxu0 %v2947_v1  ;;  %292 = vmatprep.mubr.bf16.mxu1 %v2947_v1  ;;  %v2792_v21 = vld [vmem:[%s3552_s0 + $0x4] sm:$0xf] }
   0x2   :  { %34 = vst [vmem:[#allocation2 + $0x2] sm:$0xf] %v33_v2  ;;  %v2999_v5 = vshrl.u32 %v48_v0, 7  ;;  %2925 = vset.pattern.permute.xlu0 %v2947_v1  ;;  %2926 = vset.pattern.permute.xlu1 %v2947_v1  ;;  %s2951_s27 = smov 127   ;;  %s2952_s28 = smov 15   ;;  %vm73_vm1 = vcmask 1041408  }
   0x3   :  { %v47_v6 = vunpack.c.0.s8 %v46_v4  ;;  %s2953_s29 = smov 16   ;;  %s2954_s30 = smov 113   ;;  %v712_v35 = vld [vmem:[%s3553_s3] sm:$0xf]  ;;  %vm127_vm2 = vcmask 138240   ;;  %vm69_vm3 = vcmask 31744  }
   0x4   :  { %s2955_s7 = smov 112   ;;  %s2956_s8 = smov 111   ;;  %v2738_v43 = vld [vmem:[%s3554_s1 + $0x6] sm:$0x3]  ;;  %vm327_vm4 = vcmask 1039360   ;;  %vm248_vm5 = vcmask 130048  }
   0x5   :  { %v3004_v7 = vsub.s32 %v47_v6, %v2999_v5  ;;  %v36_v54 = vld [vmem:[%s3554_s1] sm:$0x3]  ;;  %v2743_v62 = vld [vmem:[%s3554_s1 + $0x8] sm:$0x3]  ;;  %vm386_vm6 = vcmask 121856   ;;  %vm465_vm7 = vcmask 924672  }
   0x6   :  { %vm546_vm8 = vcmask 916480   ;;  %vm627_vm9 = vcmask 908288  }
   0x9   :  { %v35_v8 = vld [vmem:[#allocation2] sm:$0x3f] }
   0xa   :  { %v51_v9 = vrot.slane %v35_v8, %v3004_v7  ;;  %v44_v10 = vcombine.high %v35_v8, %v35_v8  ;;  %v301_v13 = vld [vmem:[#allocation2 + $0x2] sm:$0x3f] }
   0xb   :  { %v312_v14 = vrot.slane %v301_v13, %v3004_v7  ;;  %v305_v15 = vcombine.high %v301_v13, %v301_v13  ;;  %v439_v16 = vld [vmem:[#allocation2 + $0x2] sm:$0x3f]  ;;  %v2749_v13 = vld [vmem:[%s3554_s1 + $0xa] sm:$0x3] }
   0xc   :  { %60 = vrot.lane.b32.xlu0 %v51_v9, %s2949_s23  ;;  %v58_v11 = vrot.slane %v44_v10, %v3004_v7  ;;  %v59_v12 = vcombine.high %v51_v9, %v51_v9  ;;  %v520_v17 = vld [vmem:[#allocation2 + $0x2] sm:$0x3f]  ;;  %v450_v23 = vrot.slane %v439_v16, %v3004_v7  ;;  %v443_v24 = vcombine.high %v439_v16, %v439_v16 }
   0xd   :  { %v601_v18 = vld [vmem:[#allocation2 + $0x2] sm:$0x3f]  ;;  %v320_v19 = vcombine.high %v312_v14, %v312_v14  ;;  %v319_v22 = vrot.slane %v305_v15, %v3004_v7  ;;  %v531_v27 = vrot.slane %v520_v17, %v3004_v7  ;;  %v524_v28 = vcombine.high %v520_v17, %v520_v17 }
   0xe   :  { %64 = vrot.lane.b32.xlu1 %v58_v11, %s2949_s23  ;;  %v3015_v20 = vld.sshfl [vmem:[#allocation2 + $0x2] sm:$0x33 pattern:$0x76325410]  ;;  %v458_v25 = vcombine.high %v450_v23, %v450_v23  ;;  %v457_v26 = vrot.slane %v443_v24, %v3004_v7  ;;  %v612_v31 = vrot.slane %v601_v18, %v3004_v7  ;;  %v605_v32 = vcombine.high %v601_v18, %v601_v18 }
   0xf   :  { %1407 = vst [vmem:[#allocation2 + $0x2] sm:$0xf] %v2792_v21  ;;  %v539_v29 = vcombine.high %v531_v27, %v531_v27  ;;  %v538_v30 = vrot.slane %v524_v28, %v3004_v7  ;;  %v191_v48 = vcombine.high %v3015_v20, %v3015_v20  ;;  %v196_v56 = vsel %vm73_vm1, %v3015_v20, 0 }
  0x10   :  { %62 = vrot.lane.b32.xlu0 %v59_v12, %s2949_s23  ;;  %v620_v33 = vcombine.high %v612_v31, %v612_v31  ;;  %v619_v34 = vrot.slane %v605_v32, %v3004_v7 }
  0x12   :  { %121 = vrot.lane.b32.xlu1 %v51_v9, %s2950_s24 }
  0x14   :  { %123 = vrot.lane.b32.xlu0 %v59_v12, %s2950_s24 }
  0x16   :  { %125 = vrot.lane.b32.xlu1 %v58_v11, %s2950_s24 }
  0x18   :  { %321 = vrot.lane.b32.xlu0 %v312_v14, %s2951_s27 }
  0x1a   :  { %323 = vrot.lane.b32.xlu1 %v320_v19, %s2951_s27 }
  0x1c   :  { %325 = vrot.lane.b32.xlu0 %v319_v22, %s2951_s27 }
  0x1e   :  { %380 = vrot.lane.b32.xlu1 %v51_v9, %s2952_s28 }
  0x20   :  { %382 = vrot.lane.b32.xlu0 %v59_v12, %s2952_s28 }
  0x22   :  { %384 = vrot.lane.b32.xlu1 %v58_v11, %s2952_s28 }
  0x24   :  { %242 = vrot.lane.b32.xlu0 %v51_v9, %s2953_s29  ;;  %v2736_v9 = vld [vmem:[%s3554_s1 + $0x2] sm:$0x3] }
  0x26   :  { %244 = vrot.lane.b32.xlu1 %v59_v12, %s2953_s29 }
  0x28   :  { %246 = vrot.lane.b32.xlu0 %v58_v11, %s2953_s29 }
  0x2a   :  { %459 = vrot.lane.b32.xlu1 %v450_v23, %s2954_s30  ;;  %v2757_v23 = vld [vmem:[%s3554_s1 + $0xe] sm:$0x3] }
  0x2c   :  { %461 = vrot.lane.b32.xlu0 %v458_v25, %s2954_s30 }
  0x2e   :  { %463 = vrot.lane.b32.xlu1 %v457_v26, %s2954_s30 }
  0x30   :  { %540 = vrot.lane.b32.xlu0 %v531_v27, %s2955_s7  ;;  %v2737_v27 = vld [vmem:[%s3554_s1 + $0x4] sm:$0x3] }
  0x32   :  { %542 = vrot.lane.b32.xlu1 %v539_v29, %s2955_s7 }
  0x34   :  { %544 = vrot.lane.b32.xlu0 %v538_v30, %s2955_s7 }
  0x36   :  { %621 = vrot.lane.b32.xlu1 %v612_v31, %s2956_s8  ;;  %v2754_v31 = vld [vmem:[%s3554_s1 + $0xc] sm:$0x3] }
  0x38   :  { %623 = vrot.lane.b32.xlu0 %v620_v33, %s2956_s8  ;;  %v2760_v33 = vld [vmem:[%s3554_s1 + $0x10] sm:$0x3] }
  0x3a   :  { %625 = vrot.lane.b32.xlu1 %v619_v34, %s2956_s8  ;;  %v1408_v34 = vld [vmem:[#allocation2] sm:$0x3f] }
  0x3c   :  { %715 = vperm.xlu0 %2925, %v712_v35   ;;  %v3131_v35 = vrot.slane %v1408_v34, %v3004_v7 }
  0x40   :  { %1430 = vrot.lane.b32.xlu0 %v3131_v35, %s2949_s23 }
  0x7e   :  { %v61_v36 = vpop.permute.xlu0 %60 }
  0x80   :  { %v65_v37 = vpop.permute.xlu1 %64 }
  0x82   :  { %v63_v38 = vpop.permute.xlu0 %62 }
  0x83   :  { %v68_v39 = vsel %vm66_vm0, %v63_v38, %v65_v37  ;;  %v67_v40 = vsel %vm66_vm0, %v61_v36, %v63_v38  ;;  %v1414_v36 = vcombine.high %v1408_v34, %v1408_v34  ;;  %v3140_v38 = vcombine.high %v3131_v35, %v3131_v35  ;;  %v1665_v34 = vld [vmem:[#allocation2 + $0x2] sm:$0x3f] }
  0x84   :  { %2739 = vmatprep.subr.msk.bf16.mxu0 %vm73_vm1, %v68_v39  ;;  %v122_v41 = vpop.permute.xlu1 %121  ;;  %v75_v42 = vsel %vm73_vm1, %v67_v40, 0 }
  0x85   :  { %81 = vmatpush1.bf16.msra.mxu0 %v75_v42  ;;  %v3136_v37 = vrot.slane %v1414_v36, %v3004_v7  ;;  %1432 = vrot.lane.b32.xlu1 %v3140_v38, %s2949_s23 }
  0x86   :  { %v124_v44 = vpop.permute.xlu0 %123 }
  0x87   :  { %v128_v45 = vsel %vm127_vm2, %v122_v41, %v124_v44  ;;  %1434 = vrot.lane.b32.xlu0 %v3136_v37, %s2949_s23 }
  0x88   :  { %v134_v46 = vsel %vm73_vm1, %v128_v45, 0  ;;  %2740 = vmatmul.mubr.msk.bf16.vlgmr.msra.gmra.mrb[0].mxu0 %vm69_vm3, %v2738_v43  ;;  %v126_v47 = vpop.permute.xlu1 %125 }
  0x89   :  { %v129_v49 = vsel %vm127_vm2, %v124_v44, %v126_v47  ;;  %171 = vmatprep.mubr.bf16.mxu0 %v2947_v1 }
  0x8a   :  { %v322_v50 = vpop.permute.xlu0 %321  ;;  %2741 = vmatprep.subr.msk.bf16.mxu0 %vm73_vm1, %v129_v49 }
  0x8b   :  { %140 = vmatpush1.bf16.msra.mxu0 %v134_v46 }
  0x8c   :  { %v324_v51 = vpop.permute.xlu1 %323  ;;  %2745 = vmatprep.subr.msk.bf16.mxu0 %vm73_vm1, %v191_v48 }
  0x8d   :  { %v328_v60 = vsel %vm327_vm4, %v322_v50, %v324_v51 }
  0x8e   :  { %v326_v52 = vpop.permute.xlu0 %325  ;;  %v334_v0 = vsel %vm73_vm1, %v328_v60, 0 }
  0x8f   :  { %v329_v57 = vsel %vm327_vm4, %v324_v51, %v326_v52 }
  0x90   :  { %v381_v53 = vpop.permute.xlu1 %380 }
  0x92   :  { %v383_v55 = vpop.permute.xlu0 %382 }
  0x93   :  { %v387_v12 = vsel %vm386_vm6, %v381_v53, %v383_v55 }
  0x94   :  { %2742 = vmatmul.mubr.msk.bf16.vlgmr.msra.gmra.mrb[0].mxu0 %vm69_vm3, %v36_v54  ;;  %v385_v58 = vpop.permute.xlu1 %384  ;;  %v393_v16 = vsel %vm73_vm1, %v387_v12, 0 }
  0x95   :  { %202 = vmatpush1.bf16.msra.mxu0 %v196_v56  ;;  %233 = vmatprep.mubr.bf16.mxu0 %v2947_v1  ;;  %v388_v4 = vsel %vm386_vm6, %v383_v55, %v385_v58  ;;  %v685_v55 = vsub.s32 0, %v2999_v5  ;;  %v30_v56 = vld [vmem:[%s3555_s5] ss:$2 sm:$0x3] }
  0x96   :  { %v243_v59 = vpop.permute.xlu0 %242  ;;  %2750 = vmatprep.subr.msk.bf16.mxu0 %vm73_vm1, %v329_v57  ;;  %v689_v57 = vsub.s32 1, %v2999_v5 }
  0x97   :  { %v3151_v58 = vrot.slane %v30_v56, %v685_v55 }
  0x98   :  { %v245_v61 = vpop.permute.xlu1 %244 }
  0x99   :  { %v249_v63 = vsel %vm248_vm5, %v243_v59, %v245_v61  ;;  %v3153_v59 = vrot.slane %v30_v56, %v689_v57 }
  0x9a   :  { %v247_v2 = vpop.permute.xlu0 %246  ;;  %v255_v3 = vsel %vm73_vm1, %v249_v63, 0 }
  0x9b   :  { %v250_v6 = vsel %vm248_vm5, %v245_v61, %v247_v2  ;;  %v2735_v2 = vld [vmem:[%s3555_s5 + $0x1] ss:$2 sm:$0x3] }
  0x9c   :  { %2746 = vmatmul.mubr.msk.bf16.vlgmr.msra.gmra.mrb[4].mxu0 %vm69_vm3, %v2743_v62  ;;  %2747 = vmatprep.subr.msk.bf16.mxu1 %vm73_vm1, %v250_v6  ;;  %v460_v8 = vpop.permute.xlu1 %459  ;;  %v3162_v5 = vrot.slane %v2735_v2, %v689_v57 }
  0x9d   :  { %261 = vmatpush1.bf16.msra.mxu1 %v255_v3  ;;  %340 = vmatpush1.bf16.msra.mxu0 %v334_v0 }
  0x9e   :  { %v462_v10 = vpop.permute.xlu0 %461  ;;  %371 = vmatprep.mubr.bf16.mxu0 %v2947_v1  ;;  %2752 = vmatprep.subr.msk.bf16.mxu0 %vm73_vm1, %v388_v4 }
  0x9f   :  { %v466_v26 = vsel %vm465_vm7, %v460_v8, %v462_v10  ;;  %v3160_v8 = vrot.slane %v2735_v2, %v685_v55 }
  0xa0   :  { %2748 = vmatmul.mubr.msk.bf16.vlgmr.msra.gmra.mrb[0].mxu1 %vm69_vm3, %v2736_v9  ;;  %v464_v11 = vpop.permute.xlu1 %463  ;;  %v472_v29 = vsel %vm73_vm1, %v466_v26, 0 }
  0xa1   :  { %590 = vmatprep.mubr.bf16.mxu1 %v2947_v1  ;;  %v467_v15 = vsel %vm465_vm7, %v462_v10, %v464_v11 }
  0xa2   :  { %v541_v14 = vpop.permute.xlu0 %540 }
  0xa4   :  { %2751 = vmatmul.mubr.msk.bf16.vlgmr.msra.gmra.mrb[8].mxu0 %vm69_vm3, %v2749_v13  ;;  %v543_v17 = vpop.permute.xlu1 %542 }
  0xa5   :  { %399 = vmatpush1.bf16.msra.mxu0 %v393_v16  ;;  %v547_v18 = vsel %vm546_vm8, %v541_v14, %v543_v17  ;;  %430 = vmatprep.mubr.bf16.mxu0 %v2947_v1 }
  0xa6   :  { %v545_v19 = vpop.permute.xlu0 %544  ;;  %v553_v20 = vsel %vm73_vm1, %v547_v18, 0  ;;  %2755 = vmatprep.subr.msk.bf16.mxu0 %vm73_vm1, %v467_v15 }
  0xa7   :  { %v548_v21 = vsel %vm546_vm8, %v543_v17, %v545_v19 }
  0xa8   :  { %2758 = vmatprep.subr.msk.bf16.mxu1 %vm73_vm1, %v548_v21  ;;  %v622_v22 = vpop.permute.xlu1 %621 }
  0xa9   :  { %559 = vmatpush1.bf16.msra.mxu1 %v553_v20 }
  0xaa   :  { %v624_v24 = vpop.permute.xlu0 %623 }
  0xab   :  { %v628_v30 = vsel %vm627_vm9, %v622_v22, %v624_v24 }
  0xac   :  { %2759 = vmatmul.mubr.msk.bf16.vlgmr.msra.gmra.mrb[4].mxu1 %vm69_vm3, %v2757_v23  ;;  %v626_v25 = vpop.permute.xlu1 %625  ;;  %v634_v32 = vsel %vm73_vm1, %v628_v30, 0 }
  0xad   :  { %810 = vmatprep.mubr.bf16.mxu1 %v2947_v1  ;;  %v629_v28 = vsel %vm627_vm9, %v624_v24, %v626_v25 }
  0xb0   :  { %2753 = vmatmul.mubr.msk.bf16.vlgmr.msra.gmra.mrb[8].mxu0 %vm69_vm3, %v2737_v27 }
  0xb1   :  { %478 = vmatpush1.bf16.msra.mxu0 %v472_v29  ;;  %509 = vmatprep.mubr.bf16.mxu0 %v2947_v1 }
  0xb2   :  { %2761 = vmatprep.subr.msk.bf16.mxu0 %vm73_vm1, %v629_v28 }
  0xb8   :  { %2756 = vmatmul.mubr.msk.bf16.vlgmr.msra.gmra.mrb[0].mxu0 %vm69_vm3, %v2754_v31 }
  0xb9   :  { %640 = vmatpush1.bf16.msra.mxu0 %v634_v32  ;;  %671 = vmatprep.mubr.bf16.mxu0 %v2947_v1 }
  0xbb   :  { %v716_v14 = vpop.permute.xlu0 %715 }
  0xc0   :  { %2762 = vmatmul.mubr.msk.bf16.vlgmr.msra.gmra.mrb[8].mxu0 %vm69_vm3, %v2760_v33 }
  0xc1   :  { %988 = vmatprep.mubr.bf16.mxu0 %v2947_v1 }
 0x16f   :  { %v235_v39 = vpop.f32.mrb[4].mxu0 }
 0x170   :  { %v237_v40 = vpop.f32.mrb[5].mxu0 }
 0x171   :  { %v239_v41 = vpop.f32.mrb[6].mxu0 }
 0x172   :  { %v240_v42 = vpop.f32.mrb[7].mxu0 }
 0x173   :  { %v294_v43 = vpop.f32.mrb[0].mxu1 }
 0x174   :  { %v295_v44 = vadd.f32 %v294_v43, %v235_v39  ;;  %v296_v45 = vpop.f32.mrb[1].mxu1  ;;  %v1675_v39 = vrot.slane %v1665_v34, %v3004_v7 }
 0x175   :  { %v297_v46 = vadd.f32 %v296_v45, %v237_v40  ;;  %v298_v47 = vpop.f32.mrb[2].mxu1  ;;  %v1668_v40 = vcombine.high %v1665_v34, %v1665_v34 }
 0x176   :  { %v299_v48 = vpop.f32.mrb[3].mxu1 }
 0x177   :  { %v1682_v42 = vrot.slane %v1668_v40, %v3004_v7 }
 0x17f   :  { %v592_v49 = vpop.f32.mrb[4].mxu1 }
 0x180   :  { %v599_v50 = vadd.f32 %v592_v49, %v295_v44  ;;  %v594_v51 = vpop.f32.mrb[5].mxu1  ;;  %v1683_v44 = vcombine.high %v1675_v39, %v1675_v39 }
 0x181   :  { %v600_v52 = vadd.f32 %v594_v51, %v297_v46  ;;  %v596_v53 = vpop.f32.mrb[6].mxu1 }
 0x182   :  { %v597_v54 = vpop.f32.mrb[7].mxu1 }
 0x18b   :  { %v511_v60 = vpop.f32.mrb[0].mxu0 }
 0x18c   :  { %v693_v61 = vmul.f32 %v3151_v58, %v511_v60  ;;  %v513_v62 = vpop.f32.mrb[1].mxu0 }
 0x18d   :  { %v694_v63 = vmul.f32 %v3153_v59, %v513_v62  ;;  %v515_v0 = vpop.f32.mrb[2].mxu0  ;;  %v1958_v62 = vld [vmem:[#allocation2 + $0x2] sm:$0x3f] }
 0x18e   :  { %v695_v3 = vadd.f32 %v693_v61, %v599_v50  ;;  %v516_v4 = vpop.f32.mrb[3].mxu0 }
 0x18f   :  { %v696_v6 = vadd.f32 %v694_v63, %v600_v52  ;;  %v1800_v52 = vld [vmem:[#allocation2 + $0x2] sm:$0x3f] }
 0x190   :  { %v1810_v55 = vrot.slane %v1800_v52, %v3004_v7  ;;  %v1803_v2 = vcombine.high %v1800_v52, %v1800_v52  ;;  %v2786_v52 = vld [vmem:[%s3556_s2 + $0xe] sm:$0x3] }
 0x192   :  { %v1818_v57 = vcombine.high %v1810_v55, %v1810_v55 }
 0x193   :  { %v673_v9 = vpop.f32.mrb[8].mxu0 }
 0x194   :  { %v708_v10 = vmul.f32 %v3160_v8, %v673_v9  ;;  %v675_v11 = vpop.f32.mrb[9].mxu0  ;;  %v1961_v9 = vcombine.high %v1958_v62, %v1958_v62 }
 0x195   :  { %v709_v12 = vmul.f32 %v3162_v5, %v675_v11  ;;  %v677_v13 = vpop.f32.mrb[10].mxu0  ;;  %v1431_v11 = vpop.permute.xlu0 %1430 }
 0x196   :  { %v710_v15 = vadd.f32 %v708_v10, %v695_v3  ;;  %v678_v16 = vpop.f32.mrb[11].mxu0  ;;  %v1975_v10 = vrot.slane %v1961_v9, %v3004_v7  ;;  %v1433_v13 = vpop.permute.xlu1 %1432 }
 0x197   :  { %v711_v17 = vadd.f32 %v709_v12, %v696_v6  ;;  %v2045_v6 = vld [vmem:[%s3553_s3] sm:$0xf] }
 0x198   :  { %v718_v18 = vadd.f32 %v716_v14, %v710_v15 }
 0x199   :  { %v719_v19 = vadd.f32 %v716_v14, %v711_v17  ;;  %v1435_v12 = vpop.permute.xlu0 %1434 }
 0x19a   :  { %v720_v20 = vmax.f32 %v718_v18, 0.0 }
 0x19b   :  { %v721_v21 = vmax.f32 %v719_v19, 0.0 }
 0x19d   :  { %v2763_v22 = vpack.c.bf16 %v721_v21, %v720_v20 }
 0x19f   :  { %2764 = vst.sshfl [vmem:[#allocation3 + $0x2] sm:$0x33 pattern:$0x76325410] %v2763_v22 }
 0x1a6   :  { %v1213_v23 = vld [vmem:[#allocation3 + $0x2] sm:$0x3f] }
 0x1a7   :  { %v736_v24 = vld [vmem:[#allocation3] sm:$0x3f]  ;;  %v1224_v25 = vrot.slane %v1213_v23, %v3004_v7  ;;  %v1217_v30 = vcombine.high %v1213_v23, %v1213_v23 }
 0x1a8   :  { %v752_v26 = vrot.slane %v736_v24, %v3004_v7  ;;  %v745_v27 = vcombine.high %v736_v24, %v736_v24  ;;  %v997_v31 = vld [vmem:[#allocation3 + $0x2] sm:$0x3f] }
 0x1a9   :  { %1233 = vrot.lane.b32.xlu0 %v1224_v25, %s2955_s7  ;;  %v1008_v32 = vrot.slane %v997_v31, %v3004_v7  ;;  %v1231_v33 = vrot.slane %v1217_v30, %v3004_v7  ;;  %v1232_v36 = vcombine.high %v1224_v25, %v1224_v25  ;;  %v1293_v43 = vld [vmem:[#allocation3 + $0x2] sm:$0x3f]  ;;  %v1001_v46 = vcombine.high %v997_v31, %v997_v31 }
 0x1aa   :  { %761 = vrot.lane.b32.xlu1 %v752_v26, %s2949_s23  ;;  %v759_v28 = vrot.slane %v745_v27, %v3004_v7  ;;  %v760_v29 = vcombine.high %v752_v26, %v752_v26  ;;  %v1304_v45 = vrot.slane %v1293_v43, %v3004_v7  ;;  %v1133_v48 = vld [vmem:[#allocation3 + $0x2] sm:$0x3f]  ;;  %v1297_v51 = vcombine.high %v1293_v43, %v1293_v43 }
 0x1ab   :  { %v1016_v41 = vcombine.high %v1008_v32, %v1008_v32  ;;  %v1015_v47 = vrot.slane %v1001_v46, %v3004_v7  ;;  %v1144_v49 = vrot.slane %v1133_v48, %v3004_v7  ;;  %v1137_v54 = vcombine.high %v1133_v48, %v1133_v48 }
 0x1ac   :  { %v1311_v53 = vrot.slane %v1297_v51, %v3004_v7  ;;  %v1312_v63 = vcombine.high %v1304_v45, %v1304_v45  ;;  %v737_v51 = vld [vmem:[%s3556_s2] sm:$0x3] }
 0x1ad   :  { %765 = vrot.lane.b32.xlu0 %v759_v28, %s2949_s23  ;;  %v1152_v50 = vcombine.high %v1144_v49, %v1144_v49  ;;  %v1151_v56 = vrot.slane %v1137_v54, %v3004_v7 }
 0x1ae   :  { %939 = vrot.lane.b32.xlu1 %v752_v26, %s2953_s29 }
 0x1b1   :  { %941 = vrot.lane.b32.xlu0 %v760_v29, %s2953_s29 }
 0x1b2   :  { %819 = vrot.lane.b32.xlu1 %v752_v26, %s2950_s24 }
 0x1b5   :  { %1237 = vrot.lane.b32.xlu0 %v1231_v33, %s2955_s7  ;;  %v2765_v33 = vld [vmem:[%s3556_s2 + $0x2] sm:$0x3] }
 0x1b6   :  { %1017 = vrot.lane.b32.xlu1 %v1008_v32, %s2951_s27 }
 0x1b9   :  { %821 = vrot.lane.b32.xlu0 %v760_v29, %s2950_s24 }
 0x1ba   :  { %763 = vrot.lane.b32.xlu1 %v760_v29, %s2949_s23 }
 0x1bd   :  { %1488 = vrot.lane.b32.xlu0 %v3131_v35, %s2950_s24 }
 0x1be   :  { %943 = vrot.lane.b32.xlu1 %v759_v28, %s2953_s29 }
 0x1c1   :  { %1492 = vrot.lane.b32.xlu0 %v3136_v37, %s2950_s24 }
 0x1c2   :  { %1235 = vrot.lane.b32.xlu1 %v1232_v36, %s2955_s7 }
 0x1c5   :  { %1684 = vrot.lane.b32.xlu0 %v1675_v39, %s2951_s27 }
 0x1c6   :  { %823 = vrot.lane.b32.xlu1 %v759_v28, %s2950_s24 }
 0x1c9   :  { %1019 = vrot.lane.b32.xlu0 %v1016_v41, %s2951_s27 }
 0x1ca   :  { %1490 = vrot.lane.b32.xlu1 %v3140_v38, %s2950_s24 }
 0x1cd   :  { %1688 = vrot.lane.b32.xlu0 %v1682_v42, %s2951_s27  ;;  %v1437_v42 = vsel %vm66_vm0, %v1433_v13, %v1435_v12  ;;  %v2778_v12 = vld [vmem:[%s3556_s2 + $0xa] sm:$0x3] }
 0x1ce   :  { %1075 = vrot.lane.b32.xlu1 %v752_v26, %s2952_s28 }
 0x1d1   :  { %1313 = vrot.lane.b32.xlu0 %v1304_v45, %s2956_s8 }
 0x1d2   :  { %1686 = vrot.lane.b32.xlu1 %v1683_v44, %s2951_s27  ;;  %v2773_v44 = vld.sshfl [vmem:[#allocation3 + $0x2] sm:$0x33 pattern:$0x76325410] }
 0x1d5   :  { %1077 = vrot.lane.b32.xlu0 %v760_v29, %s2952_s28 }
 0x1d6   :  { %1021 = vrot.lane.b32.xlu1 %v1015_v47, %s2951_s27 }
 0x1d9   :  { %1744 = vrot.lane.b32.xlu0 %v3140_v38, %s2952_s28 }
 0x1da   :  { %1153 = vrot.lane.b32.xlu1 %v1144_v49, %s2954_s30  ;;  %v888_v49 = vcombine.high %v2773_v44, %v2773_v44 }
 0x1dd   :  { %1155 = vrot.lane.b32.xlu0 %v1152_v50, %s2954_s30  ;;  %v1436_v50 = vsel %vm66_vm0, %v1431_v11, %v1433_v13 }
 0x1de   :  { %1742 = vrot.lane.b32.xlu1 %v3131_v35, %s2952_s28 }
 0x1e1   :  { %1607 = vrot.lane.b32.xlu0 %v3131_v35, %s2953_s29  ;;  %v1879_v35 = vld [vmem:[#allocation2 + $0x2] sm:$0x3f] }
 0x1e2   :  { %1079 = vrot.lane.b32.xlu1 %v759_v28, %s2952_s28  ;;  %v1889_v60 = vrot.slane %v1879_v35, %v3004_v7  ;;  %v1882_v61 = vcombine.high %v1879_v35, %v1879_v35  ;;  %v2767_v28 = vld [vmem:[%s3556_s2 + $0x6] sm:$0x3] }
 0x1e4   :  { %v1896_v0 = vrot.slane %v1882_v61, %v3004_v7  ;;  %v1897_v4 = vcombine.high %v1889_v60, %v1889_v60  ;;  %v2801_v61 = vld.sshfl [vmem:[#allocation2 + $0x2] sm:$0x33 pattern:$0x76325410] }
 0x1e5   :  { %1317 = vrot.lane.b32.xlu0 %v1311_v53, %s2956_s8 }
 0x1e6   :  { %1746 = vrot.lane.b32.xlu1 %v3136_v37, %s2952_s28 }
 0x1e9   :  { %1611 = vrot.lane.b32.xlu0 %v3136_v37, %s2953_s29  ;;  %v1968_v37 = vrot.slane %v1958_v62, %v3004_v7 }
 0x1ea   :  { %1157 = vrot.lane.b32.xlu1 %v1151_v56, %s2954_s30  ;;  %v1442_v56 = vsel %vm73_vm1, %v1436_v50, 0 }
 0x1eb   :  { %v1976_v3 = vcombine.high %v1968_v37, %v1968_v37 }
 0x1ed   :  { %1821 = vrot.lane.b32.xlu0 %v1818_v57, %s2954_s30  ;;  %v893_v57 = vsel %vm73_vm1, %v2773_v44, 0 }
 0x1ee   :  { %1609 = vrot.lane.b32.xlu1 %v3140_v38, %s2953_s29  ;;  %v1817_v38 = vrot.slane %v1803_v2, %v3004_v7 }
 0x1f1   :  { %1898 = vrot.lane.b32.xlu0 %v1889_v60, %s2955_s7 }
 0x1f2   :  { %1315 = vrot.lane.b32.xlu1 %v1312_v63, %s2956_s8  ;;  %v2772_v63 = vld [vmem:[%s3556_s2 + $0x8] sm:$0x3] }
 0x1f5   :  { %1902 = vrot.lane.b32.xlu0 %v1896_v0, %s2955_s7  ;;  %v2795_v0 = vld [vmem:[%s3554_s1 + $0x6] sm:$0x3] }
 0x1f6   :  { %1819 = vrot.lane.b32.xlu1 %v1810_v55, %s2954_s30 }
 0x1f9   :  { %1979 = vrot.lane.b32.xlu0 %v1976_v3, %s2956_s8 }
 0x1fa   :  { %1823 = vrot.lane.b32.xlu1 %v1817_v38, %s2954_s30  ;;  %v1556_v38 = vcombine.high %v2801_v61, %v2801_v61 }
 0x1fd   :  { %2048 = vperm.xlu0 %2925, %v2045_v6  }
 0x1fe   :  { %1900 = vrot.lane.b32.xlu1 %v1897_v4, %s2955_s7 }
 0x202   :  { %1977 = vrot.lane.b32.xlu1 %v1968_v37, %s2956_s8 }
 0x206   :  { %1981 = vrot.lane.b32.xlu1 %v1975_v10, %s2956_s8 }
 0x21b   :  { %v1234_v14 = vpop.permute.xlu0 %1233 }
 0x21c   :  { %v762_v15 = vpop.permute.xlu1 %761 }
 0x21f   :  { %v766_v16 = vpop.permute.xlu0 %765 }
 0x220   :  { %v940_v17 = vpop.permute.xlu1 %939 }
 0x223   :  { %v942_v18 = vpop.permute.xlu0 %941 }
 0x224   :  { %v820_v19 = vpop.permute.xlu1 %819  ;;  %v945_v27 = vsel %vm248_vm5, %v940_v17, %v942_v18 }
 0x225   :  { %v951_v32 = vsel %vm73_vm1, %v945_v27, 0  ;;  %v2800_v27 = vld [vmem:[%s3554_s1 + $0x8] sm:$0x3] }
 0x227   :  { %v1238_v20 = vpop.permute.xlu0 %1237 }
 0x228   :  { %v3241_v21 = vpop.permute.xlu1 %1017 }
 0x22b   :  { %v822_v22 = vpop.permute.xlu0 %821 }
 0x22c   :  { %v764_v23 = vpop.permute.xlu1 %763  ;;  %v825_v43 = vsel %vm127_vm2, %v820_v19, %v822_v22 }
 0x22d   :  { %v767_v24 = vsel %vm66_vm0, %v762_v15, %v764_v23  ;;  %v768_v25 = vsel %vm66_vm0, %v764_v23, %v766_v16  ;;  %v831_v48 = vsel %vm73_vm1, %v825_v43, 0  ;;  %v1409_v15 = vld [vmem:[%s3554_s1] sm:$0x3] }
 0x22e   :  { %v773_v26 = vsel %vm73_vm1, %v767_v24, 0  ;;  %2768 = vmatprep.subr.msk.bf16.mxu1 %vm73_vm1, %v768_v25 }
 0x22f   :  { %779 = vmatpush1.bf16.msra.mxu1 %v773_v26  ;;  %v1489_v29 = vpop.permute.xlu0 %1488  ;;  %v2766_v26 = vld [vmem:[%s3556_s2 + $0x4] sm:$0x3] }
 0x230   :  { %v944_v30 = vpop.permute.xlu1 %943 }
 0x231   :  { %v946_v31 = vsel %vm248_vm5, %v942_v18, %v944_v30  ;;  %v1561_v18 = vsel %vm73_vm1, %v2801_v61, 0 }
 0x232   :  { %2769 = vmatmul.mubr.msk.bf16.vlgmr.msra.gmra.mrb[8].mxu1 %vm69_vm3, %v2767_v28  ;;  %2776 = vmatprep.subr.msk.bf16.mxu0 %vm73_vm1, %v946_v31 }
 0x233   :  { %957 = vmatpush1.bf16.msra.mxu0 %v951_v32  ;;  %868 = vmatprep.mubr.bf16.mxu1 %v2947_v1  ;;  %v1493_v34 = vpop.permute.xlu0 %1492 }
 0x234   :  { %v1236_v36 = vpop.permute.xlu1 %1235 }
 0x235   :  { %v1239_v39 = vsel %vm546_vm8, %v1234_v14, %v1236_v36  ;;  %v1240_v40 = vsel %vm546_vm8, %v1236_v36, %v1238_v20 }
 0x236   :  { %v1245_v41 = vsel %vm73_vm1, %v1239_v39, 0  ;;  %2777 = vmatmul.mubr.msk.bf16.vlgmr.msra.gmra.mrb[12].mxu0 %vm69_vm3, %v2765_v33  ;;  %2787 = vmatprep.subr.msk.bf16.mxu0 %vm73_vm1, %v1240_v40 }
 0x237   :  { %1251 = vmatpush1.bf16.msra.mxu0 %v1245_v41  ;;  %1282 = vmatprep.mubr.bf16.mxu0 %v2947_v1  ;;  %v3267_v45 = vpop.permute.xlu0 %1684  ;;  %v2783_v41 = vld [vmem:[%s3556_s2 + $0xc] sm:$0x3] }
 0x238   :  { %2796 = vmatprep.subr.msk.bf16.mxu0 %vm73_vm1, %v1437_v42  ;;  %v824_v46 = vpop.permute.xlu1 %823  ;;  %v2806_v42 = vld [vmem:[%s3554_s1 + $0xa] sm:$0x3] }
 0x239   :  { %v826_v47 = vsel %vm127_vm2, %v822_v22, %v824_v46 }
 0x23a   :  { %2770 = vmatprep.subr.msk.bf16.mxu1 %vm73_vm1, %v826_v47 }
 0x23b   :  { %837 = vmatpush1.bf16.msra.mxu1 %v831_v48  ;;  %v1020_v53 = vpop.permute.xlu0 %1019 }
 0x23c   :  { %2774 = vmatprep.subr.msk.bf16.mxu1 %vm73_vm1, %v888_v49  ;;  %v1491_v54 = vpop.permute.xlu1 %1490  ;;  %v1023_v4 = vsel %vm327_vm4, %v3241_v21, %v1020_v53 }
 0x23d   :  { %v1495_v55 = vsel %vm127_vm2, %v1491_v54, %v1493_v34  ;;  %v1494_v62 = vsel %vm127_vm2, %v1489_v29, %v1491_v54  ;;  %v1029_v11 = vsel %vm73_vm1, %v1023_v4, 0 }
 0x23e   :  { %2771 = vmatmul.mubr.msk.bf16.vlgmr.msra.gmra.mrb[8].mxu1 %vm69_vm3, %v737_v51  ;;  %2788 = vmatmul.mubr.msk.bf16.vlgmr.msra.gmra.mrb[16].mxu0 %vm69_vm3, %v2786_v52  ;;  %v1500_v3 = vsel %vm73_vm1, %v1494_v62, 0  ;;  %v2789_v52 = vld [vmem:[%s3556_s2 + $0x10] sm:$0x3] }
 0x23f   :  { %1448 = vmatpush1.bf16.msra.mxu0 %v1442_v56  ;;  %899 = vmatpush1.bf16.msra.mxu1 %v893_v57  ;;  %v1689_v35 = vpop.permute.xlu0 %1688  ;;  %v2794_v57 = vld [vmem:[%s3554_s1 + $0x4] sm:$0x3] }
 0x240   :  { %2798 = vmatprep.subr.msk.bf16.mxu0 %vm73_vm1, %v1495_v55  ;;  %v1076_v60 = vpop.permute.xlu1 %1075  ;;  %930 = vmatprep.mubr.bf16.mxu1 %v2947_v1 }
 0x241   :  { %1479 = vmatprep.mubr.bf16.mxu0 %v2947_v1 }
 0x243   :  { %v3296_v2 = vpop.permute.xlu0 %1313 }
 0x244   :  { %v1687_v37 = vpop.permute.xlu1 %1686 }
 0x245   :  { %v1691_v19 = vsel %vm327_vm4, %v1687_v37, %v1689_v35  ;;  %v1690_v25 = vsel %vm327_vm4, %v3267_v45, %v1687_v37 }
 0x246   :  { %2775 = vmatmul.mubr.msk.bf16.vlgmr.msra.gmra.mrb[12].mxu1 %vm69_vm3, %v2772_v63  ;;  %2797 = vmatmul.mubr.msk.bf16.vlgmr.msra.gmra.mrb[20].mxu0 %vm69_vm3, %v2795_v0  ;;  %v1696_v30 = vsel %vm73_vm1, %v1690_v25, 0  ;;  %v2793_v63 = vld [vmem:[%s3554_s1 + $0x2] sm:$0x3] }
 0x247   :  { %1506 = vmatpush1.bf16.msra.mxu0 %v1500_v3  ;;  %1066 = vmatprep.mubr.bf16.mxu1 %v2947_v1  ;;  %v1078_v6 = vpop.permute.xlu0 %1077  ;;  %v2811_v3 = vld [vmem:[%s3554_s1 + $0xc] sm:$0x3] }
 0x248   :  { %v1022_v9 = vpop.permute.xlu1 %1021  ;;  %1537 = vmatprep.mubr.bf16.mxu0 %v2947_v1  ;;  %2802 = vmatprep.subr.msk.bf16.mxu0 %vm73_vm1, %v1556_v38  ;;  %v1081_v20 = vsel %vm386_vm6, %v1076_v60, %v1078_v6 }
 0x249   :  { %v1024_v10 = vsel %vm327_vm4, %v1020_v53, %v1022_v9  ;;  %v1087_v24 = vsel %vm73_vm1, %v1081_v20, 0 }
 0x24a   :  { %2779 = vmatprep.subr.msk.bf16.mxu1 %vm73_vm1, %v1024_v10  ;;  %v2814_v10 = vld [vmem:[%s3554_s1 + $0xe] sm:$0x3] }
 0x24b   :  { %1035 = vmatpush1.bf16.msra.mxu1 %v1029_v11  ;;  %v1745_v13 = vpop.permute.xlu0 %1744 }
 0x24c   :  { %v1154_v14 = vpop.permute.xlu1 %1153 }
 0x24e   :  { %2780 = vmatmul.mubr.msk.bf16.vlgmr.msra.gmra.mrb[16].mxu1 %vm69_vm3, %v2778_v12 }
 0x24f   :  { %1124 = vmatprep.mubr.bf16.mxu1 %v2947_v1  ;;  %v1156_v16 = vpop.permute.xlu0 %1155 }
 0x250   :  { %v1743_v17 = vpop.permute.xlu1 %1742  ;;  %v1159_v32 = vsel %vm465_vm7, %v1154_v14, %v1156_v16  ;;  %v2817_v14 = vld [vmem:[%s3554_s1 + $0x10] sm:$0x3] }
 0x251   :  { %v1165_v36 = vsel %vm73_vm1, %v1159_v32, 0  ;;  %v1748_v40 = vsel %vm386_vm6, %v1743_v17, %v1745_v13 }
 0x252   :  { %2799 = vmatmul.mubr.msk.bf16.vlgmr.msra.gmra.mrb[20].mxu0 %vm69_vm3, %v1409_v15  ;;  %v1754_v44 = vsel %vm73_vm1, %v1748_v40, 0 }
 0x253   :  { %1567 = vmatpush1.bf16.msra.mxu0 %v1561_v18  ;;  %1598 = vmatprep.mubr.bf16.mxu0 %v2947_v1  ;;  %v1608_v21 = vpop.permute.xlu0 %1607 }
 0x254   :  { %2807 = vmatprep.subr.msk.bf16.mxu0 %vm73_vm1, %v1691_v19  ;;  %v1080_v22 = vpop.permute.xlu1 %1079 }
 0x255   :  { %v1082_v23 = vsel %vm386_vm6, %v1078_v6, %v1080_v22 }
 0x256   :  { %2781 = vmatprep.subr.msk.bf16.mxu1 %vm73_vm1, %v1082_v23 }
 0x257   :  { %1093 = vmatpush1.bf16.msra.mxu1 %v1087_v24  ;;  %v1318_v31 = vpop.permute.xlu0 %1317 }
 0x258   :  { %v1747_v28 = vpop.permute.xlu1 %1746 }
 0x259   :  { %v1749_v29 = vsel %vm386_vm6, %v1745_v13, %v1747_v28 }
 0x25a   :  { %2782 = vmatmul.mubr.msk.bf16.vlgmr.msra.gmra.mrb[16].mxu1 %vm69_vm3, %v2766_v26  ;;  %2803 = vmatmul.mubr.msk.bf16.vlgmr.msra.gmra.mrb[24].mxu0 %vm69_vm3, %v2800_v27 }
 0x25b   :  { %1702 = vmatpush1.bf16.msra.mxu0 %v1696_v30  ;;  %1202 = vmatprep.mubr.bf16.mxu1 %v2947_v1  ;;  %v1612_v39 = vpop.permute.xlu0 %1611 }
 0x25c   :  { %2809 = vmatprep.subr.msk.bf16.mxu0 %vm73_vm1, %v1749_v29  ;;  %v1158_v33 = vpop.permute.xlu1 %1157  ;;  %1733 = vmatprep.mubr.bf16.mxu0 %v2947_v1 }
 0x25d   :  { %v1160_v34 = vsel %vm465_vm7, %v1156_v16, %v1158_v33 }
 0x25e   :  { %2784 = vmatprep.subr.msk.bf16.mxu1 %vm73_vm1, %v1160_v34 }
 0x25f   :  { %1171 = vmatpush1.bf16.msra.mxu1 %v1165_v36  ;;  %v1822_v45 = vpop.permute.xlu0 %1821 }
 0x260   :  { %v1610_v43 = vpop.permute.xlu1 %1609 }
 0x261   :  { %v1613_v50 = vsel %vm248_vm5, %v1608_v21, %v1610_v43  ;;  %v1614_v51 = vsel %vm248_vm5, %v1610_v43, %v1612_v39 }
 0x262   :  { %2785 = vmatmul.mubr.msk.bf16.vlgmr.msra.gmra.mrb[8].mxu1 %vm69_vm3, %v2783_v41  ;;  %2808 = vmatmul.mubr.msk.bf16.vlgmr.msra.gmra.mrb[28].mxu0 %vm69_vm3, %v2806_v42  ;;  %v1619_v55 = vsel %vm73_vm1, %v1613_v50, 0 }
 0x263   :  { %1760 = vmatpush1.bf16.msra.mxu0 %v1754_v44  ;;  %1362 = vmatprep.mubr.bf16.mxu1 %v2947_v1  ;;  %v1899_v54 = vpop.permute.xlu0 %1898 }
 0x264   :  { %v1316_v46 = vpop.permute.xlu1 %1315  ;;  %1791 = vmatprep.mubr.bf16.mxu0 %v2947_v1 }
 0x265   :  { %v1319_v47 = vsel %vm627_vm9, %v3296_v2, %v1316_v46  ;;  %v1320_v48 = vsel %vm627_vm9, %v1316_v46, %v1318_v31 }
 0x266   :  { %v1325_v49 = vsel %vm73_vm1, %v1319_v47, 0  ;;  %2790 = vmatprep.subr.msk.bf16.mxu1 %vm73_vm1, %v1320_v48 }
 0x267   :  { %1331 = vmatpush1.bf16.msra.mxu1 %v1325_v49  ;;  %v1903_v62 = vpop.permute.xlu0 %1902 }
 0x268   :  { %2804 = vmatprep.subr.msk.bf16.mxu1 %vm73_vm1, %v1614_v51  ;;  %v1820_v53 = vpop.permute.xlu1 %1819 }
 0x269   :  { %v1825_v56 = vsel %vm465_vm7, %v1820_v53, %v1822_v45 }
 0x26a   :  { %2791 = vmatmul.mubr.msk.bf16.vlgmr.msra.gmra.mrb[16].mxu1 %vm69_vm3, %v2789_v52  ;;  %v1831_v61 = vsel %vm73_vm1, %v1825_v56, 0 }
 0x26b   :  { %1625 = vmatpush1.bf16.msra.mxu1 %v1619_v55  ;;  %1656 = vmatprep.mubr.bf16.mxu1 %v2947_v1  ;;  %v1980_v6 = vpop.permute.xlu0 %1979 }
 0x26c   :  { %v1824_v35 = vpop.permute.xlu1 %1823 }
 0x26d   :  { %v1826_v60 = vsel %vm465_vm7, %v1822_v45, %v1824_v35 }
 0x26e   :  { %2810 = vmatmul.mubr.msk.bf16.vlgmr.msra.gmra.mrb[28].mxu0 %vm69_vm3, %v2794_v57  ;;  %2812 = vmatprep.subr.msk.bf16.mxu0 %vm73_vm1, %v1826_v60 }
 0x26f   :  { %1837 = vmatpush1.bf16.msra.mxu0 %v1831_v61  ;;  %1868 = vmatprep.mubr.bf16.mxu0 %v2947_v1 }
 0x270   :  { %v1901_v0 = vpop.permute.xlu1 %1900 }
 0x271   :  { %v1904_v2 = vsel %vm546_vm8, %v1899_v54, %v1901_v0  ;;  %v1905_v37 = vsel %vm546_vm8, %v1901_v0, %v1903_v62 }
 0x272   :  { %v1910_v38 = vsel %vm73_vm1, %v1904_v2, 0  ;;  %2805 = vmatmul.mubr.msk.bf16.vlgmr.msra.gmra.mrb[20].mxu1 %vm69_vm3, %v2793_v63  ;;  %2815 = vmatprep.subr.msk.bf16.mxu1 %vm73_vm1, %v1905_v37 }
 0x273   :  { %1916 = vmatpush1.bf16.msra.mxu1 %v1910_v38  ;;  %1947 = vmatprep.mubr.bf16.mxu1 %v2947_v1 }
 0x274   :  { %v1978_v4 = vpop.permute.xlu1 %1977 }
 0x275   :  { %v1983_v9 = vsel %vm627_vm9, %v1978_v4, %v1980_v6 }
 0x276   :  { %2813 = vmatmul.mubr.msk.bf16.vlgmr.msra.gmra.mrb[20].mxu0 %vm69_vm3, %v2811_v3  ;;  %v1989_v13 = vsel %vm73_vm1, %v1983_v9, 0 }
 0x277   :  { %2026 = vmatprep.mubr.bf16.mxu0 %v2947_v1 }
 0x278   :  { %v1982_v11 = vpop.permute.xlu1 %1981 }
 0x279   :  { %v1984_v12 = vsel %vm627_vm9, %v1980_v6, %v1982_v11 }
 0x27a   :  { %2816 = vmatmul.mubr.msk.bf16.vlgmr.msra.gmra.mrb[24].mxu1 %vm69_vm3, %v2814_v10  ;;  %2818 = vmatprep.subr.msk.bf16.mxu0 %vm73_vm1, %v1984_v12 }
 0x27b   :  { %1995 = vmatpush1.bf16.msra.mxu0 %v1989_v13  ;;  %2140 = vmatprep.mubr.bf16.mxu1 %v2947_v1 }
 0x27e   :  { %2819 = vmatmul.mubr.msk.bf16.vlgmr.msra.gmra.mrb[28].mxu0 %vm69_vm3, %v2817_v14 }
 0x27f   :  { %2317 = vmatprep.mubr.bf16.mxu0 %v2947_v1 }
 0x309   :  { %v990_v15 = vpop.f32.mrb[12].mxu0 }
 0x30a   :  { %v992_v16 = vpop.f32.mrb[13].mxu0 }
 0x30b   :  { %v994_v17 = vpop.f32.mrb[14].mxu0 }
 0x30c   :  { %v995_v18 = vpop.f32.mrb[15].mxu0 }
 0x311   :  { %v1284_v19 = vpop.f32.mrb[16].mxu0 }
 0x312   :  { %v1286_v20 = vpop.f32.mrb[17].mxu0 }
 0x313   :  { %v1288_v21 = vpop.f32.mrb[18].mxu0 }
 0x314   :  { %v1289_v22 = vpop.f32.mrb[19].mxu0 }
 0x319   :  { %v932_v23 = vpop.f32.mrb[12].mxu1 }
 0x31a   :  { %v991_v24 = vadd.f32 %v990_v15, %v932_v23  ;;  %v934_v25 = vpop.f32.mrb[13].mxu1 }
 0x31b   :  { %v993_v26 = vadd.f32 %v992_v16, %v934_v25  ;;  %v936_v27 = vpop.f32.mrb[14].mxu1 }
 0x31c   :  { %v1291_v28 = vadd.f32 %v1284_v19, %v991_v24  ;;  %v937_v29 = vpop.f32.mrb[15].mxu1 }
 0x31d   :  { %v1292_v30 = vadd.f32 %v1286_v20, %v993_v26  ;;  %v2049_v20 = vpop.permute.xlu0 %2048 }
 0x32d   :  { %v1600_v31 = vpop.f32.mrb[24].mxu0 }
 0x32e   :  { %v1602_v32 = vpop.f32.mrb[25].mxu0 }
 0x32f   :  { %v1604_v33 = vpop.f32.mrb[26].mxu0 }
 0x330   :  { %v1605_v34 = vpop.f32.mrb[27].mxu0 }
 0x335   :  { %v1204_v36 = vpop.f32.mrb[8].mxu1 }
 0x336   :  { %v1373_v39 = vmul.f32 %v1204_v36, %v3151_v58  ;;  %v1206_v40 = vpop.f32.mrb[9].mxu1 }
 0x337   :  { %v1374_v41 = vmul.f32 %v1206_v40, %v3153_v59  ;;  %v1208_v42 = vpop.f32.mrb[10].mxu1 }
 0x338   :  { %v1375_v43 = vadd.f32 %v1373_v39, %v1291_v28  ;;  %v1209_v44 = vpop.f32.mrb[11].mxu1 }
 0x339   :  { %v1376_v45 = vadd.f32 %v1374_v41, %v1292_v30 }
 0x33d   :  { %v1364_v46 = vpop.f32.mrb[16].mxu1 }
 0x33e   :  { %v1377_v47 = vmul.f32 %v1364_v46, %v3160_v8  ;;  %v1366_v48 = vpop.f32.mrb[17].mxu1 }
 0x33f   :  { %v1378_v49 = vmul.f32 %v1366_v48, %v3162_v5  ;;  %v1368_v50 = vpop.f32.mrb[18].mxu1 }
 0x340   :  { %v1369_v51 = vpop.f32.mrb[19].mxu1  ;;  %v3412_v52 = vadd.f32 %v1377_v47, %v1375_v43 }
 0x341   :  { %v3414_v53 = vadd.f32 %v1378_v49, %v1376_v45 }
 0x345   :  { %v1658_v54 = vpop.f32.mrb[20].mxu1 }
 0x346   :  { %v1659_v55 = vadd.f32 %v1658_v54, %v1600_v31  ;;  %v1660_v56 = vpop.f32.mrb[21].mxu1 }
 0x347   :  { %v1661_v57 = vadd.f32 %v1660_v56, %v1602_v32  ;;  %v1662_v35 = vpop.f32.mrb[22].mxu1 }
 0x348   :  { %v1663_v60 = vpop.f32.mrb[23].mxu1  ;;  %v2706_v35 = vld [vmem:[%s3557_s4] sm:$0xf] }
 0x349   :  { %v1870_v61 = vpop.f32.mrb[20].mxu0 }
 0x34a   :  { %v1872_v62 = vpop.f32.mrb[21].mxu0  ;;  %v2037_v37 = vmul.f32 %v1870_v61, %v3151_v58 }
 0x34b   :  { %v1874_v63 = vpop.f32.mrb[22].mxu0  ;;  %v2038_v4 = vmul.f32 %v1872_v62, %v3153_v59 }
 0x34c   :  { %v1875_v0 = vpop.f32.mrb[23].mxu0 }
 0x34d   :  { %v1949_v2 = vpop.f32.mrb[24].mxu1 }
 0x34e   :  { %v1956_v38 = vadd.f32 %v1949_v2, %v1659_v55  ;;  %v1951_v3 = vpop.f32.mrb[25].mxu1 }
 0x34f   :  { %v1957_v6 = vadd.f32 %v1951_v3, %v1661_v57  ;;  %v1953_v9 = vpop.f32.mrb[26].mxu1  ;;  %v1381_v57 = vld [vmem:[%s3557_s4] sm:$0xf] }
 0x350   :  { %v2039_v10 = vadd.f32 %v2037_v37, %v1956_v38  ;;  %v1954_v11 = vpop.f32.mrb[27].mxu1  ;;  %v2824_v37 = vld [vmem:[%s3556_s2 + $0x6] sm:$0x3] }
 0x351   :  { %v2040_v12 = vadd.f32 %v2038_v4, %v1957_v6  ;;  %v2028_v13 = vpop.f32.mrb[28].mxu0 }
 0x352   :  { %v2041_v14 = vmul.f32 %v2028_v13, %v3160_v8  ;;  %v2030_v15 = vpop.f32.mrb[29].mxu0 }
 0x353   :  { %v2042_v16 = vmul.f32 %v2030_v15, %v3162_v5  ;;  %v2032_v17 = vpop.f32.mrb[30].mxu0 }
 0x354   :  { %v2043_v18 = vadd.f32 %v2041_v14, %v2039_v10  ;;  %v2033_v19 = vpop.f32.mrb[31].mxu0 }
 0x355   :  { %v2044_v21 = vadd.f32 %v2042_v16, %v2040_v12  ;;  %v2070_v16 = vld [vmem:[%s3556_s2] sm:$0x3] }
 0x356   :  { %v2051_v22 = vadd.f32 %v2049_v20, %v2043_v18 }
 0x357   :  { %v2052_v23 = vadd.f32 %v2049_v20, %v2044_v21 }
 0x358   :  { %v2053_v24 = vmax.f32 %v2051_v22, 0.0 }
 0x359   :  { %v2054_v25 = vmax.f32 %v2052_v23, 0.0 }
 0x35b   :  { %v2820_v26 = vpack.c.bf16 %v2054_v25, %v2053_v24  ;;  %v2829_v24 = vld [vmem:[%s3556_s2 + $0x8] sm:$0x3] }
 0x35d   :  { %2821 = vst.sshfl [vmem:[#allocation3 + $0x2] sm:$0x33 pattern:$0x76325410] %v2820_v26 }
 0x364   :  { %v2069_v27 = vld [vmem:[#allocation3] sm:$0x3f] }
 0x365   :  { %v2082_v28 = vrot.slane %v2069_v27, %v3004_v7  ;;  %v2075_v29 = vcombine.high %v2069_v27, %v2069_v27  ;;  %v2326_v32 = vld [vmem:[#allocation3 + $0x2] sm:$0x3f] }
 0x366   :  { %v2336_v33 = vrot.slane %v2326_v32, %v3004_v7  ;;  %v2329_v34 = vcombine.high %v2326_v32, %v2326_v32  ;;  %v2461_v40 = vld [vmem:[#allocation3 + $0x2] sm:$0x3f] }
 0x367   :  { %2091 = vrot.lane.b32.xlu1 %v2082_v28, %s2949_s23  ;;  %v2090_v30 = vcombine.high %v2082_v28, %v2082_v28  ;;  %v2089_v31 = vrot.slane %v2075_v29, %v3004_v7  ;;  %v2540_v41 = vld [vmem:[#allocation3 + $0x2] sm:$0x3f]  ;;  %v2471_v42 = vrot.slane %v2461_v40, %v3004_v7  ;;  %v2464_v46 = vcombine.high %v2461_v40, %v2461_v40  ;;  %v2822_v40 = vld [vmem:[%s3556_s2 + $0x2] sm:$0x3] }
 0x368   :  { %v2343_v36 = vrot.slane %v2329_v34, %v3004_v7  ;;  %v2344_v39 = vcombine.high %v2336_v33, %v2336_v33  ;;  %v2619_v43 = vld [vmem:[#allocation3 + $0x2] sm:$0x3f]  ;;  %v2550_v44 = vrot.slane %v2540_v41, %v3004_v7  ;;  %v2543_v48 = vcombine.high %v2540_v41, %v2540_v41 }
 0x369   :  { %2093 = vrot.lane.b32.xlu0 %v2090_v30, %s2949_s23  ;;  %v2629_v45 = vrot.slane %v2619_v43, %v3004_v7  ;;  %v2479_v47 = vcombine.high %v2471_v42, %v2471_v42  ;;  %v2478_v49 = vrot.slane %v2464_v46, %v3004_v7  ;;  %v2622_v54 = vcombine.high %v2619_v43, %v2619_v43  ;;  %v2830_v4 = vld.sshfl [vmem:[#allocation3 + $0x2] sm:$0x33 pattern:$0x76325410] }
 0x36a   :  { %v2557_v50 = vrot.slane %v2543_v48, %v3004_v7  ;;  %v2558_v51 = vcombine.high %v2550_v44, %v2550_v44  ;;  %v2217_v12 = vcombine.high %v2830_v4, %v2830_v4  ;;  %v2222_v19 = vsel %vm73_vm1, %v2830_v4, 0  ;;  %v2835_v34 = vld [vmem:[%s3556_s2 + $0xa] sm:$0x3] }
 0x36b   :  { %2095 = vrot.lane.b32.xlu1 %v2089_v31, %s2949_s23  ;;  %v2637_v55 = vcombine.high %v2629_v45, %v2629_v45  ;;  %v2636_v56 = vrot.slane %v2622_v54, %v3004_v7 }
 0x36d   :  { %2149 = vrot.lane.b32.xlu0 %v2082_v28, %s2950_s24 }
 0x36f   :  { %2151 = vrot.lane.b32.xlu1 %v2090_v30, %s2950_s24 }
 0x371   :  { %2153 = vrot.lane.b32.xlu0 %v2089_v31, %s2950_s24 }
 0x373   :  { %2345 = vrot.lane.b32.xlu1 %v2336_v33, %s2951_s27 }
 0x375   :  { %2403 = vrot.lane.b32.xlu0 %v2082_v28, %s2952_s28 }
 0x377   :  { %2349 = vrot.lane.b32.xlu1 %v2343_v36, %s2951_s27 }
 0x379   :  { %2347 = vrot.lane.b32.xlu0 %v2344_v39, %s2951_s27 }
 0x37b   :  { %2268 = vrot.lane.b32.xlu1 %v2082_v28, %s2953_s29 }
 0x37d   :  { %2480 = vrot.lane.b32.xlu0 %v2471_v42, %s2954_s30 }
 0x37f   :  { %2559 = vrot.lane.b32.xlu1 %v2550_v44, %s2955_s7 }
 0x381   :  { %2638 = vrot.lane.b32.xlu0 %v2629_v45, %s2956_s8 }
 0x383   :  { %2405 = vrot.lane.b32.xlu1 %v2090_v30, %s2952_s28 }
 0x385   :  { %2407 = vrot.lane.b32.xlu0 %v2089_v31, %s2952_s28 }
 0x387   :  { %2272 = vrot.lane.b32.xlu1 %v2089_v31, %s2953_s29 }
 0x389   :  { %2270 = vrot.lane.b32.xlu0 %v2090_v30, %s2953_s29 }
 0x38b   :  { %2482 = vrot.lane.b32.xlu1 %v2479_v47, %s2954_s30 }
 0x38d   :  { %2484 = vrot.lane.b32.xlu0 %v2478_v49, %s2954_s30  ;;  %v2843_v49 = vld [vmem:[%s3556_s2 + $0xe] sm:$0x3] }
 0x38f   :  { %2563 = vrot.lane.b32.xlu1 %v2557_v50, %s2955_s7 }
 0x391   :  { %2561 = vrot.lane.b32.xlu0 %v2558_v51, %s2955_s7  ;;  %v2823_v51 = vld [vmem:[%s3556_s2 + $0x4] sm:$0x3] }
 0x393   :  { %2640 = vrot.lane.b32.xlu1 %v2637_v55, %s2956_s8 }
 0x395   :  { %2642 = vrot.lane.b32.xlu0 %v2636_v56, %s2956_s8 }
 0x397   :  { %1384 = vperm.xlu1 %2926, %v1381_v57  }
 0x399   :  { %2709 = vperm.xlu0 %2925, %v2706_v35  }
 0x3d9   :  { %v2092_v60 = vpop.permute.xlu1 %2091 }
 0x3db   :  { %v2094_v61 = vpop.permute.xlu0 %2093 }
 0x3dc   :  { %v2097_v62 = vsel %vm66_vm0, %v2092_v60, %v2094_v61  ;;  %v2840_v60 = vld [vmem:[%s3556_s2 + $0xc] sm:$0x3] }
 0x3dd   :  { %v2096_v63 = vpop.permute.xlu1 %2095  ;;  %v2103_v7 = vsel %vm73_vm1, %v2097_v62, 0 }
 0x3de   :  { %v2098_v0 = vsel %vm66_vm0, %v2094_v61, %v2096_v63  ;;  %v1391_v61 = vld [vmem:[%s3552_s0] sm:$0xff]  }
 0x3df   :  { %v2150_v2 = vpop.permute.xlu0 %2149  ;;  %2825 = vmatprep.subr.msk.bf16.mxu1 %vm73_vm1, %v2098_v0  ;;  %v1392_v63 = vunpack.c.l.bf16 %v1391_v61 }
 0x3e0   :  { %2109 = vmatpush1.bf16.msra.mxu1 %v2103_v7 }
 0x3e1   :  { %v2152_v38 = vpop.permute.xlu1 %2151  ;;  %v1394_v7 = vcombine.high %v1392_v63, %v1392_v63 }
 0x3e2   :  { %v2155_v3 = vsel %vm127_vm2, %v2150_v2, %v2152_v38 }
 0x3e3   :  { %v2154_v6 = vpop.permute.xlu0 %2153  ;;  %2826 = vmatmul.mubr.msk.bf16.vlgmr.msra.gmra.mrb[28].mxu1 %vm69_vm3, %v2824_v37  ;;  %v2161_v10 = vsel %vm73_vm1, %v2155_v3, 0 }
 0x3e4   :  { %v2156_v9 = vsel %vm127_vm2, %v2152_v38, %v2154_v6  ;;  %2198 = vmatprep.mubr.bf16.mxu1 %v2947_v1  ;;  %v2846_v38 = vld [vmem:[%s3556_s2 + $0x10] sm:$0x3] }
 0x3e5   :  { %2827 = vmatprep.subr.msk.bf16.mxu1 %vm73_vm1, %v2156_v9  ;;  %v2346_v11 = vpop.permute.xlu1 %2345 }
 0x3e6   :  { %2167 = vmatpush1.bf16.msra.mxu1 %v2161_v10 }
 0x3e7   :  { %v2404_v13 = vpop.permute.xlu0 %2403  ;;  %2831 = vmatprep.subr.msk.bf16.mxu1 %vm73_vm1, %v2217_v12 }
 0x3e9   :  { %v2350_v14 = vpop.permute.xlu1 %2349 }
 0x3eb   :  { %v2348_v15 = vpop.permute.xlu0 %2347 }
 0x3ec   :  { %v2352_v20 = vsel %vm327_vm4, %v2348_v15, %v2350_v14  ;;  %v2351_v23 = vsel %vm327_vm4, %v2346_v11, %v2348_v15 }
 0x3ed   :  { %v2269_v17 = vpop.permute.xlu1 %2268  ;;  %v2357_v26 = vsel %vm73_vm1, %v2351_v23, 0 }
 0x3ef   :  { %v2481_v18 = vpop.permute.xlu0 %2480  ;;  %2828 = vmatmul.mubr.msk.bf16.vlgmr.msra.gmra.mrb[28].mxu1 %vm69_vm3, %v2070_v16 }
 0x3f0   :  { %2228 = vmatpush1.bf16.msra.mxu1 %v2222_v19  ;;  %2259 = vmatprep.mubr.bf16.mxu1 %v2947_v1 }
 0x3f1   :  { %2836 = vmatprep.subr.msk.bf16.mxu1 %vm73_vm1, %v2352_v20  ;;  %v2560_v21 = vpop.permute.xlu1 %2559 }
 0x3f3   :  { %v2639_v22 = vpop.permute.xlu0 %2638 }
 0x3f5   :  { %v2406_v25 = vpop.permute.xlu1 %2405 }
 0x3f6   :  { %v2409_v31 = vsel %vm386_vm6, %v2404_v13, %v2406_v25 }
 0x3f7   :  { %v2408_v27 = vpop.permute.xlu0 %2407  ;;  %2832 = vmatmul.mubr.msk.bf16.vlgmr.msra.gmra.mrb[32].mxu1 %vm69_vm3, %v2829_v24  ;;  %v2415_v41 = vsel %vm73_vm1, %v2409_v31, 0 }
 0x3f8   :  { %v2410_v28 = vsel %vm386_vm6, %v2406_v25, %v2408_v27  ;;  %2363 = vmatpush1.bf16.msra.mxu1 %v2357_v26  ;;  %2394 = vmatprep.mubr.bf16.mxu1 %v2947_v1 }
 0x3f9   :  { %2838 = vmatprep.subr.msk.bf16.mxu1 %vm73_vm1, %v2410_v28  ;;  %v2273_v29 = vpop.permute.xlu1 %2272 }
 0x3fb   :  { %v2271_v30 = vpop.permute.xlu0 %2270 }
 0x3fc   :  { %v2274_v32 = vsel %vm248_vm5, %v2269_v17, %v2271_v30  ;;  %v2275_v33 = vsel %vm248_vm5, %v2271_v30, %v2273_v29 }
 0x3fd   :  { %v2280_v36 = vsel %vm73_vm1, %v2274_v32, 0  ;;  %2833 = vmatprep.subr.msk.bf16.mxu0 %vm73_vm1, %v2275_v33  ;;  %v2483_v39 = vpop.permute.xlu1 %2482 }
 0x3fe   :  { %2286 = vmatpush1.bf16.msra.mxu0 %v2280_v36  ;;  %v2486_v50 = vsel %vm465_vm7, %v2481_v18, %v2483_v39 }
 0x3ff   :  { %v2485_v42 = vpop.permute.xlu0 %2484  ;;  %2837 = vmatmul.mubr.msk.bf16.vlgmr.msra.gmra.mrb[36].mxu1 %vm69_vm3, %v2835_v34  ;;  %v2492_v55 = vsel %vm73_vm1, %v2486_v50, 0 }
 0x400   :  { %v2487_v43 = vsel %vm465_vm7, %v2483_v39, %v2485_v42  ;;  %2421 = vmatpush1.bf16.msra.mxu1 %v2415_v41  ;;  %2452 = vmatprep.mubr.bf16.mxu1 %v2947_v1 }
 0x401   :  { %2834 = vmatmul.mubr.msk.bf16.vlgmr.msra.gmra.mrb[32].mxu0 %vm69_vm3, %v2822_v40  ;;  %2841 = vmatprep.subr.msk.bf16.mxu1 %vm73_vm1, %v2487_v43  ;;  %v2564_v44 = vpop.permute.xlu1 %2563  ;;  %v2717_v40 = vunpack.c.h.bf16 %v1391_v61 }
 0x402   :  { %2608 = vmatprep.mubr.bf16.mxu0 %v2947_v1 }
 0x403   :  { %v2562_v45 = vpop.permute.xlu0 %2561 }
 0x404   :  { %v2565_v46 = vsel %vm546_vm8, %v2560_v21, %v2562_v45  ;;  %v2566_v47 = vsel %vm546_vm8, %v2562_v45, %v2564_v44 }
 0x405   :  { %v2571_v48 = vsel %vm73_vm1, %v2565_v46, 0  ;;  %2844 = vmatprep.subr.msk.bf16.mxu0 %vm73_vm1, %v2566_v47  ;;  %v2641_v56 = vpop.permute.xlu1 %2640 }
 0x406   :  { %2577 = vmatpush1.bf16.msra.mxu0 %v2571_v48  ;;  %v2644_v35 = vsel %vm627_vm9, %v2639_v22, %v2641_v56  ;;  %v2719_v48 = vcombine.high %v2717_v40, %v2717_v40 }
 0x407   :  { %v2643_v54 = vpop.permute.xlu0 %2642  ;;  %v2650_v62 = vsel %vm73_vm1, %v2644_v35, 0 }
 0x408   :  { %v2645_v57 = vsel %vm627_vm9, %v2641_v56, %v2643_v54 }
 0x409   :  { %2845 = vmatmul.mubr.msk.bf16.vlgmr.msra.gmra.mrb[36].mxu0 %vm69_vm3, %v2843_v49 }
 0x40b   :  { %2839 = vmatmul.mubr.msk.bf16.vlgmr.msra.gmra.mrb[36].mxu1 %vm69_vm3, %v2823_v51 }
 0x40c   :  { %2498 = vmatpush1.bf16.msra.mxu1 %v2492_v55  ;;  %2529 = vmatprep.mubr.bf16.mxu1 %v2947_v1 }
 0x40d   :  { %2847 = vmatprep.subr.msk.bf16.mxu1 %vm73_vm1, %v2645_v57 }
 0x413   :  { %2842 = vmatmul.mubr.msk.bf16.vlgmr.msra.gmra.mrb[28].mxu1 %vm69_vm3, %v2840_v60 }
 0x414   :  { %2656 = vmatpush1.bf16.msra.mxu1 %v2650_v62  ;;  %2687 = vmatprep.mubr.bf16.mxu1 %v2947_v1 }
 0x416   :  { %v1385_v0 = vpop.permute.xlu1 %1384 }
 0x417   :  { %v1387_v2 = vadd.f32 %v1385_v0, %v3412_v52  ;;  %v1388_v37 = vadd.f32 %v1385_v0, %v3414_v53 }
 0x418   :  { %v2710_v45 = vpop.permute.xlu0 %2709 }
 0x419   :  { %v1389_v3 = vmax.f32 %v1387_v2, 0.0  ;;  %v1390_v4 = vmax.f32 %v1388_v37, 0.0 }
 0x41b   :  { %v1396_v6 = vadd.f32 %v1392_v63, %v1389_v3  ;;  %v1397_v9 = vadd.f32 %v1394_v7, %v1390_v4  ;;  %2848 = vmatmul.mubr.msk.bf16.vlgmr.msra.gmra.mrb[36].mxu1 %vm69_vm3, %v2846_v38 }
 0x41d   :  { %v1398_v10 = vmax.f32 %v1396_v6, 0.0  ;;  %v1399_v11 = vmax.f32 %v1397_v9, 0.0 }
 0x41f   :  { %v1402_v12 = vcombine.low %v1398_v10, %v1399_v11 }
 0x421   :  { %1404 = vst [vmem:[%s3558_s6] sm:$0xff] %v1402_v12 }
 0x4ca   :  { %v2261_v1 = vpop.f32.mrb[32].mxu1 }
 0x4cb   :  { %v2263_v52 = vpop.f32.mrb[33].mxu1 }
 0x4cc   :  { %v2265_v53 = vpop.f32.mrb[34].mxu1 }
 0x4cd   :  { %v2266_v13 = vpop.f32.mrb[35].mxu1 }
 0x4d4   :  { %v2319_v14 = vpop.f32.mrb[32].mxu0 }
 0x4d5   :  { %v2320_v15 = vadd.f32 %v2319_v14, %v2261_v1  ;;  %v2321_v16 = vpop.f32.mrb[33].mxu0 }
 0x4d6   :  { %v2322_v17 = vadd.f32 %v2321_v16, %v2263_v52  ;;  %v2323_v18 = vpop.f32.mrb[34].mxu0 }
 0x4d7   :  { %v2324_v19 = vpop.f32.mrb[35].mxu0 }
 0x4dc   :  { %v2610_v20 = vpop.f32.mrb[36].mxu0 }
 0x4dd   :  { %v2617_v21 = vadd.f32 %v2610_v20, %v2320_v15  ;;  %v2612_v22 = vpop.f32.mrb[37].mxu0 }
 0x4de   :  { %v2618_v23 = vadd.f32 %v2612_v22, %v2322_v17  ;;  %v2614_v24 = vpop.f32.mrb[38].mxu0 }
 0x4df   :  { %v2615_v25 = vpop.f32.mrb[39].mxu0 }
 0x4e6   :  { %v2531_v26 = vpop.f32.mrb[28].mxu1 }
 0x4e7   :  { %v2698_v27 = vmul.f32 %v2531_v26, %v3151_v58  ;;  %v2533_v28 = vpop.f32.mrb[29].mxu1 }
 0x4e8   :  { %v2699_v29 = vmul.f32 %v2533_v28, %v3153_v59  ;;  %v2535_v30 = vpop.f32.mrb[30].mxu1 }
 0x4e9   :  { %v2700_v31 = vadd.f32 %v2698_v27, %v2617_v21  ;;  %v2536_v32 = vpop.f32.mrb[31].mxu1 }
 0x4ea   :  { %v2701_v33 = vadd.f32 %v2699_v29, %v2618_v23 }
 0x4ee   :  { %v2689_v34 = vpop.f32.mrb[36].mxu1 }
 0x4ef   :  { %v2702_v36 = vmul.f32 %v2689_v34, %v3160_v8  ;;  %v2691_v39 = vpop.f32.mrb[37].mxu1 }
 0x4f0   :  { %v2703_v41 = vmul.f32 %v2691_v39, %v3162_v5  ;;  %v2693_v42 = vpop.f32.mrb[38].mxu1 }
 0x4f1   :  { %v2704_v43 = vadd.f32 %v2702_v36, %v2700_v31  ;;  %v2694_v44 = vpop.f32.mrb[39].mxu1 }
 0x4f2   :  { %v2705_v46 = vadd.f32 %v2703_v41, %v2701_v33 }
 0x4f3   :  { %v2712_v58 = vadd.f32 %v2710_v45, %v2704_v43 }
 0x4f4   :  { %v2713_v47 = vadd.f32 %v2710_v45, %v2705_v46 }
 0x4f5   :  { %v2714_v59 = vmax.f32 %v2712_v58, 0.0 }
 0x4f6   :  { %v2715_v49 = vmax.f32 %v2713_v47, 0.0 }
 0x4f7   :  { %v2721_v50 = vadd.f32 %v2717_v40, %v2714_v59 }
 0x4f8   :  { %v2722_v51 = vadd.f32 %v2719_v48, %v2715_v49 }
 0x4f9   :  { %v2723_v54 = vmax.f32 %v2721_v50, 0.0 }
 0x4fa   :  { %v2724_v55 = vmax.f32 %v2722_v51, 0.0 }
 0x4fc   :  { %v2727_v56 = vcombine.low %v2723_v54, %v2724_v55 }
 0x4fe   :  { %2850 = vst [vmem:[%s3558_s6 + $0x8] sm:$0xff] %v2727_v56 }

</bundles_post_ra>
